<compile_context>
chip_gen: v7x
topology: tpu7x:2x2x1
jax: 0.10.0
libtpu: 0.0.40
codegen_flags: <defaults>
</compile_context>

<pallas_src>
import functools

import jax
import jax.numpy as jnp
from jax.experimental import pallas as pl
from jax.experimental.pallas import tpu as pltpu


# ---------------------------------------------------------------------------
# Pallas kernel: fused T-step DDPM sampling chain
# grid = (T,); step s corresponds to diffusion timestep t = T-1-s
# (all per-t tables are pre-reversed in the wrapper so they are indexed by s).
# ---------------------------------------------------------------------------
def gfnode_chain_kernel(
    coef_ref,        # SMEM (T, 8) f32 (scalar prefetch), per step s:
                     #  [sqrt_alphas_cumprod[t], sqrt_one_minus_alphas_cumprod[t],
                     #   exp(posterior_log_variance_clipped[t]/2),
                     #   posterior_mean_coef1[t], posterior_mean_coef2[t], 0,0,0]
    bt_ref,          # VMEM (1, 1, Hh) f32 : b1 + time_embedding[t]   (pipelined)
    x_ref,           # VMEM (B, D) f32     : x_T                      (resident)
    noise_ref,       # VMEM (1, B, D) f32  : per-step noise           (pipelined)
    w1_ref,          # VMEM (D, Hh) bf16   : layer-1 weight           (resident)
    w2_ref,          # VMEM (Hh, 2D) bf16  : [mean | sigma] heads     (resident)
    b2_ref,          # VMEM (1, 2D) f32    : [mean | sigma] bias      (resident)
    out_ref,         # VMEM (B, D) f32 : carried x-state, flushed once at the end
    pf_mean_ref,     # VMEM (B, D) f32 : last-step pf_mean
    pflogvars_ref,   # VMEM (B, D) f32 : last-step pflogvars
    *,
    d_out,
):
    s = pl.program_id(0)
    last = pl.num_programs(0) - 1

    # Initialize the carried state from x_T on the first step; out_ref stays
    # VMEM-resident across the whole grid (constant output block index).
    @pl.when(s == 0)
    def _():
        out_ref[...] = x_ref[...]

    x = out_ref[...]                                   # f32 (B, D)

    # --- run_policy: 2-layer MLP, fused mean+sigma heads (bf16 MXU, f32 acc) ---
    h = jnp.tanh(
        jnp.dot(x.astype(jnp.bfloat16), w1_ref[...],
                preferred_element_type=jnp.float32)
        + bt_ref[0]                                    # (1, Hh) broadcast over B
    )
    y = (
        jnp.dot(h.astype(jnp.bfloat16), w2_ref[...],
                preferred_element_type=jnp.float32)
        + b2_ref[...]
    )                                                  # (B, 2D)
    pf_mean = y[:, :d_out]
    pflogvars = jnp.tanh(y[:, d_out:]) * 2.0           # self.logvarrange = 2

    # --- diffusion posterior step (clip=True path, maybe_clip = clamp(-1,1)) ---
    sqrt_ac = coef_ref[s, 0]
    sqrt_1mac = coef_ref[s, 1]
    post_std = coef_ref[s, 2]                          # precomputed exp(plvc/2)
    c1 = coef_ref[s, 3]
    c2 = coef_ref[s, 4]

    x_start_pred = jnp.clip(sqrt_ac * x - sqrt_1mac * pf_mean, -1.0, 1.0)
    out_ref[...] = c1 * x_start_pred + c2 * x + post_std * noise_ref[0]

    @pl.when(s == last)
    def _():
        pf_mean_ref[...] = pf_mean                     # module attrs after loop
        pflogvars_ref[...] = pflogvars


# ---------------------------------------------------------------------------
# Shared packing (kernel and pure-JAX reference consume identical tensors,
# so bf16 weight quantization is apples-to-apples)
# ---------------------------------------------------------------------------
def _pack(x, noise_all, params, sched):
    B, C, H, W = x.shape
    Tn = noise_all.shape[0]
    D = C * H * W
    Hh = params["w1"].shape[1]
    t_rev = jnp.arange(Tn - 1, -1, -1)                 # t = T-1 ... 0

    zeros = jnp.zeros((Tn,), jnp.float32)
    coefs = jnp.stack(
        [
            sched["sqrt_alphas_cumprod"][t_rev],
            sched["sqrt_one_minus_alphas_cumprod"][t_rev],
            jnp.exp(0.5 * sched["posterior_log_variance_clipped"][t_rev]),
            sched["posterior_mean_coef1"][t_rev],
            sched["posterior_mean_coef2"][t_rev],
            zeros, zeros, zeros,
        ],
        axis=1,
    ).astype(jnp.float32)                              # (T, 8)

    bt = (params["b1"][None, :] + params["temb"])[t_rev]
    bt = bt.reshape(Tn, 1, Hh).astype(jnp.float32)     # (T, 1, Hh)

    w1 = params["w1"].astype(jnp.bfloat16)                                   # (D, Hh)
    w2 = jnp.concatenate([params["w2m"], params["w2s"]], axis=1).astype(jnp.bfloat16)  # (Hh, 2D)
    b2 = jnp.concatenate([params["b2m"], params["b2s"]])[None, :].astype(jnp.float32)  # (1, 2D)

    return dict(
        coefs=coefs, bt=bt, w1=w1, w2=w2, b2=b2,
        x=x.reshape(B, D).astype(jnp.float32),
        noise=noise_all.reshape(Tn, B, D).astype(jnp.float32),
        B=B, C=C, H=H, W=W, D=D, Hh=Hh, T=Tn,
    )


# ---------------------------------------------------------------------------
# Wrapper: one pallas_call for the whole sampling chain
# ---------------------------------------------------------------------------
def gfn_sample_chain(x, noise_all, params, sched):
    """Run T fused GFNode.forward steps (backward=False, last=False, ddim=False).

    x: (B, C, H, W) f32 initial state x_T.  noise_all: (T, B, C, H, W) f32.
    Returns (x after T steps, last-step pf_mean, last-step pflogvars), each NCHW.
    """
    p = _pack(x, noise_all, params, sched)
    B, D, Hh, Tn = p["B"], p["D"], p["Hh"], p["T"]

    grid_spec = pltpu.PrefetchScalarGridSpec(
        num_scalar_prefetch=1,                         # coefs -> SMEM
        grid=(Tn,),
        in_specs=[
            pl.BlockSpec((1, 1, Hh), lambda s, c: (s, 0, 0)),    # bt      (pipelined)
            pl.BlockSpec((B, D), lambda s, c: (0, 0)),           # x_T     (resident)
            pl.BlockSpec((1, B, D), lambda s, c: (s, 0, 0)),     # noise   (pipelined)
            pl.BlockSpec((D, Hh), lambda s, c: (0, 0)),          # w1 bf16 (resident)
            pl.BlockSpec((Hh, 2 * D), lambda s, c: (0, 0)),      # w2 bf16 (resident)
            pl.BlockSpec((1, 2 * D), lambda s, c: (0, 0)),       # b2      (resident)
        ],
        out_specs=(
            pl.BlockSpec((B, D), lambda s, c: (0, 0)),           # x state / final out
            pl.BlockSpec((B, D), lambda s, c: (0, 0)),           # pf_mean (last step)
            pl.BlockSpec((B, D), lambda s, c: (0, 0)),           # pflogvars (last step)
        ),
    )

    fn = pl.pallas_call(
        functools.partial(gfnode_chain_kernel, d_out=D),
        out_shape=(
            jax.ShapeDtypeStruct((B, D), jnp.float32),
            jax.ShapeDtypeStruct((B, D), jnp.float32),
            jax.ShapeDtypeStruct((B, D), jnp.float32),
        ),
        grid_spec=grid_spec,
        compiler_params=pltpu.CompilerParams(
            dimension_semantics=("arbitrary",),        # sequential t loop
            vmem_limit_bytes=32 * 1024 * 1024,
        ),
    )
    out, pf_mean, pflogvars = fn(
        p["coefs"], p["bt"], p["x"], p["noise"], p["w1"], p["w2"], p["b2"]
    )
    shape = (B, p["C"], p["H"], p["W"])
    return out.reshape(shape), pf_mean.reshape(shape), pflogvars.reshape(shape)


# ---------------------------------------------------------------------------
# Pure-JAX reference (same bf16 math, no Pallas) — checks out, pf_mean, pflogvars
# ---------------------------------------------------------------------------
def gfn_sample_chain_ref(x, noise_all, params, sched):
    p = _pack(x, noise_all, params, sched)
    B, D, Tn = p["B"], p["D"], p["T"]
    xf = p["x"]
    pf_mean = pflogvars = None
    for s in range(Tn):
        h = jnp.tanh(
            jnp.dot(xf.astype(jnp.bfloat16), p["w1"],
                    preferred_element_type=jnp.float32)
            + p["bt"][s]
        )
        y = jnp.dot(h.astype(jnp.bfloat16), p["w2"],
                    preferred_element_type=jnp.float32) + p["b2"]
        pf_mean = y[:, :D]
        pflogvars = jnp.tanh(y[:, D:]) * 2.0
        c = p["coefs"][s]
        x_start = jnp.clip(c[0] * xf - c[1] * pf_mean, -1.0, 1.0)
        xf = c[3] * x_start + c[4] * xf + c[2] * p["noise"][s]
    shape = (B, p["C"], p["H"], p["W"])
    return xf.reshape(shape), pf_mean.reshape(shape), pflogvars.reshape(shape)


# ---------------------------------------------------------------------------
# Deterministic schedule + parameter construction
# ---------------------------------------------------------------------------
def make_schedule(T=10):
    betas = jnp.linspace(1e-4, 2e-2, T, dtype=jnp.float32)
    alphas = 1.0 - betas
    alphas_cumprod = jnp.cumprod(alphas)
    alphas_cumprod_prev = jnp.concatenate(
        [jnp.ones((1,), jnp.float32), alphas_cumprod[:-1]]
    )
    posterior_variance = betas * (1.0 - alphas_cumprod_prev) / (1.0 - alphas_cumprod)
    posterior_log_variance_clipped = jnp.log(
        jnp.maximum(posterior_variance, posterior_variance[1])
    )
    return {
        "alphas_cumprod": alphas_cumprod,
        "sqrt_alphas_cumprod": jnp.sqrt(alphas_cumprod),
        "sqrt_one_minus_alphas_cumprod": jnp.sqrt(1.0 - alphas_cumprod),
        "posterior_log_variance_clipped": posterior_log_variance_clipped,
        "posterior_mean_coef1": betas * jnp.sqrt(alphas_cumprod_prev) / (1.0 - alphas_cumprod),
        "posterior_mean_coef2": (1.0 - alphas_cumprod_prev) * jnp.sqrt(alphas) / (1.0 - alphas_cumprod),
    }


def make_params(key, D, Hh, T):
    ks = jax.random.split(key, 7)
    s1 = 1.0 / jnp.sqrt(D)
    s2 = 1.0 / jnp.sqrt(Hh)
    return {
        "w1": jax.random.normal(ks[0], (D, Hh), jnp.float32) * s1,
        "b1": jax.random.normal(ks[1], (Hh,), jnp.float32) * 0.01,
        "temb": jax.random.normal(ks[2], (T, Hh), jnp.float32) * 0.1,
        "w2m": jax.random.normal(ks[3], (Hh, D), jnp.float32) * s2,
        "b2m": jax.random.normal(ks[4], (D,), jnp.float32) * 0.01,
        "w2s": jax.random.normal(ks[5], (Hh, D), jnp.float32) * s2,
        "b2s": jax.random.normal(ks[6], (D,), jnp.float32) * 0.01,
    }


if __name__ == "__main__":
    B, C, Hs, Ws = 8, 4, 16, 16        # small NCHW input; B=8 fills vreg sublanes
    D = C * Hs * Ws                    # 1024
    Hh = 256                           # policy MLP hidden width (MXU-friendly)
    T = 10                             # diffusion steps (fused in one kernel)

    key = jax.random.PRNGKey(0)
    kx, kn, kp = jax.random.split(key, 3)
    x = jax.random.normal(kx, (B, C, Hs, Ws), jnp.float32)
    noise_all = jax.random.normal(kn, (T, B, C, Hs, Ws), jnp.float32)
    params = make_params(kp, D, Hh, T)
    sched = make_schedule(T)

    out, pf_mean, pflogvars = gfn_sample_chain(x, noise_all, params, sched)
    out = jax.block_until_ready(out)
    pf_mean = jax.block_until_ready(pf_mean)
    pflogvars = jax.block_until_ready(pflogvars)

    ref_out, ref_pf, ref_plv = gfn_sample_chain_ref(x, noise_all, params, sched)
    ref_out = jax.block_until_ready(ref_out)

    assert out.shape == (B, C, Hs, Ws)
    assert jnp.allclose(out, ref_out, atol=2e-2, rtol=2e-2), "out mismatch vs reference"
    assert jnp.allclose(pf_mean, ref_pf, atol=2e-2, rtol=2e-2), "pf_mean mismatch vs reference"
    assert jnp.allclose(pflogvars, ref_plv, atol=2e-2, rtol=2e-2), "pflogvars mismatch vs reference"

    # TODO(synk): langevin branch (autograd of an external log_reward), drift_model,
    # and the backward / ddim / last=True branches are control-flow/glue outside the
    # default hot path; only forward (backward=False, last=False, ddim=False) is fused.
    print("KERNEL_OK")
</pallas_src>

<mosaic_0001>
module attributes {stable_mosaic.version = 11 : i64} {
  func.func @gfnode_chain_kernel(%arg0: i32, %arg1: memref<10x8xf32, #tpu.memory_space<smem>>, %arg2: memref<1x1x256xf32, #tpu.memory_space<vmem>>, %arg3: memref<8x1024xf32, #tpu.memory_space<vmem>>, %arg4: memref<1x8x1024xf32, #tpu.memory_space<vmem>>, %arg5: memref<1024x256xbf16, #tpu.memory_space<vmem>>, %arg6: memref<256x2048xbf16, #tpu.memory_space<vmem>>, %arg7: memref<1x2048xf32, #tpu.memory_space<vmem>>, %arg8: memref<8x1024xf32, #tpu.memory_space<vmem>>, %arg9: memref<8x1024xf32, #tpu.memory_space<vmem>>, %arg10: memref<8x1024xf32, #tpu.memory_space<vmem>>) attributes {dimension_semantics = [#tpu.dimension_semantics<arbitrary>], iteration_bounds = array<i64: 10>, scalar_prefetch = 1 : i64, scratch_operands = 0 : i64, tpu.core_type = #tpu.core_type<tc>, window_params = [{transform_indices = @transform_0, window_bounds = array<i64: 1, 1, 256>}, {pipeline_mode = #tpu.pipeline_mode<synchronous>, transform_indices = @transform_1, window_bounds = array<i64: 8, 1024>}, {transform_indices = @transform_2, window_bounds = array<i64: 1, 8, 1024>}, {pipeline_mode = #tpu.pipeline_mode<synchronous>, transform_indices = @transform_3, window_bounds = array<i64: 1024, 256>}, {pipeline_mode = #tpu.pipeline_mode<synchronous>, transform_indices = @transform_4, window_bounds = array<i64: 256, 2048>}, {pipeline_mode = #tpu.pipeline_mode<synchronous>, transform_indices = @transform_5, window_bounds = array<i64: 1, 2048>}, {pipeline_mode = #tpu.pipeline_mode<synchronous>, transform_indices = @transform_6, window_bounds = array<i64: 8, 1024>}, {pipeline_mode = #tpu.pipeline_mode<synchronous>, transform_indices = @transform_7, window_bounds = array<i64: 8, 1024>}, {pipeline_mode = #tpu.pipeline_mode<synchronous>, transform_indices = @transform_8, window_bounds = array<i64: 8, 1024>}]} {
    %c0_i32 = arith.constant 0 : i32
    %0 = arith.cmpi eq, %arg0, %c0_i32 : i32
    %1 = arith.extui %0 : i1 to i32
    %c0_i32_0 = arith.constant 0 : i32
    %2 = arith.cmpi ne, %1, %c0_i32_0 : i32
    scf.if %2 {
      %c0_22 = arith.constant 0 : index
      %c0_23 = arith.constant 0 : index
      %56 = vector.load %arg3[%c0_22, %c0_23] : memref<8x1024xf32, #tpu.memory_space<vmem>>, vector<8x1024xf32>
      %c0_24 = arith.constant 0 : index
      %c0_25 = arith.constant 0 : index
      %57 = vector.load %arg8[%c0_24, %c0_25] : memref<8x1024xf32, #tpu.memory_space<vmem>>, vector<8x1024xf32>
      tpu.vector_store %arg8[%c0_24, %c0_25], %56 {strides = array<i32>} : memref<8x1024xf32, #tpu.memory_space<vmem>>, vector<8x1024xf32>,
    } else {
    }
    %c0 = arith.constant 0 : index
    %c0_1 = arith.constant 0 : index
    %3 = vector.load %arg8[%c0, %c0_1] : memref<8x1024xf32, #tpu.memory_space<vmem>>, vector<8x1024xf32>
    %4 = arith.truncf %3 : vector<8x1024xf32> to vector<8x1024xbf16>
    %c0_2 = arith.constant 0 : index
    %c0_3 = arith.constant 0 : index
    %5 = vector.load %arg5[%c0_2, %c0_3] : memref<1024x256xbf16, #tpu.memory_space<vmem>>, vector<1024x256xbf16>
    %cst = arith.constant dense<0.000000e+00> : vector<8x256xf32>
    %6 = tpu.matmul %4, %5, %cst {dimension_numbers = #tpu.dot_dimension_numbers<[1], [0], [0], [1], [0, 0, 1, 1], [], []>} : vector<8x1024xbf16>, vector<1024x256xbf16>, vector<8x256xf32> -> vector<8x256xf32>
    %c0_4 = arith.constant 0 : index
    %c0_5 = arith.constant 0 : index
    %c0_6 = arith.constant 0 : index
    %7 = vector.load %arg2[%c0_4, %c0_5, %c0_6] : memref<1x1x256xf32, #tpu.memory_space<vmem>>, vector<1x1x256xf32>
    %8 = vector.shape_cast %7 : vector<1x1x256xf32> to vector<1x256xf32>
    %9 = vector.broadcast %8 : vector<1x256xf32> to vector<8x256xf32>
    %10 = arith.addf %6, %9 : vector<8x256xf32>
    %11 = math.tanh %10 : vector<8x256xf32>
    %12 = arith.truncf %11 : vector<8x256xf32> to vector<8x256xbf16>
    %c0_7 = arith.constant 0 : index
    %c0_8 = arith.constant 0 : index
    %13 = vector.load %arg6[%c0_7, %c0_8] : memref<256x2048xbf16, #tpu.memory_space<vmem>>, vector<256x2048xbf16>
    %cst_9 = arith.constant dense<0.000000e+00> : vector<8x2048xf32>
    %14 = tpu.matmul %12, %13, %cst_9 {dimension_numbers = #tpu.dot_dimension_numbers<[1], [0], [0], [1], [0, 0, 1, 1], [], []>} : vector<8x256xbf16>, vector<256x2048xbf16>, vector<8x2048xf32> -> vector<8x2048xf32>
    %c0_10 = arith.constant 0 : index
    %c0_11 = arith.constant 0 : index
    %15 = vector.load %arg7[%c0_10, %c0_11] : memref<1x2048xf32, #tpu.memory_space<vmem>>, vector<1x2048xf32>
    %16 = vector.broadcast %15 : vector<1x2048xf32> to vector<8x2048xf32>
    %17 = arith.addf %14, %16 : vector<8x2048xf32>
    %18 = vector.extract_strided_slice %17 {offsets = [0, 0], sizes = [8, 1024], strides = [1, 1]} : vector<8x2048xf32> to vector<8x1024xf32>
    %19 = vector.extract_strided_slice %17 {offsets = [0, 1024], sizes = [8, 1024], strides = [1, 1]} : vector<8x2048xf32> to vector<8x1024xf32>
    %20 = math.tanh %19 : vector<8x1024xf32>
    %cst_12 = arith.constant 2.000000e+00 : f32
    %21 = vector.broadcast %cst_12 : f32 to vector<8x1024xf32>
    %22 = arith.mulf %20, %21 : vector<8x1024xf32>
    %23 = arith.index_cast %arg0 : i32 to index
    %c0_13 = arith.constant 0 : index
    %24 = memref.load %arg1[%23, %c0_13] : memref<10x8xf32, #tpu.memory_space<smem>>
    %25 = arith.index_cast %arg0 : i32 to index
    %c1 = arith.constant 1 : index
    %26 = memref.load %arg1[%25, %c1] : memref<10x8xf32, #tpu.memory_space<smem>>
    %27 = arith.index_cast %arg0 : i32 to index
    %c2 = arith.constant 2 : index
    %28 = memref.load %arg1[%27, %c2] : memref<10x8xf32, #tpu.memory_space<smem>>
    %29 = arith.index_cast %arg0 : i32 to index
    %c3 = arith.constant 3 : index
    %30 = memref.load %arg1[%29, %c3] : memref<10x8xf32, #tpu.memory_space<smem>>
    %31 = arith.index_cast %arg0 : i32 to index
    %c4 = arith.constant 4 : index
    %32 = memref.load %arg1[%31, %c4] : memref<10x8xf32, #tpu.memory_space<smem>>
    %33 = vector.broadcast %24 : f32 to vector<8x1024xf32>
    %34 = arith.mulf %33, %3 : vector<8x1024xf32>
    %35 = vector.broadcast %26 : f32 to vector<8x1024xf32>
    %36 = arith.mulf %35, %18 : vector<8x1024xf32>
    %37 = arith.subf %34, %36 : vector<8x1024xf32>
    %cst_14 = arith.constant -1.000000e+00 : f32
    %cst_15 = arith.constant 1.000000e+00 : f32
    %38 = vector.broadcast %cst_14 : f32 to vector<8x1024xf32>
    %39 = arith.maximumf %38, %37 : vector<8x1024xf32>
    %40 = vector.broadcast %cst_15 : f32 to vector<8x1024xf32>
    %41 = arith.minimumf %40, %39 : vector<8x1024xf32>
    %42 = vector.broadcast %30 : f32 to vector<8x1024xf32>
    %43 = arith.mulf %42, %41 : vector<8x1024xf32>
    %44 = vector.broadcast %32 : f32 to vector<8x1024xf32>
    %45 = arith.mulf %44, %3 : vector<8x1024xf32>
    %46 = arith.addf %43, %45 : vector<8x1024xf32>
    %c0_16 = arith.constant 0 : index
    %c0_17 = arith.constant 0 : index
    %c0_18 = arith.constant 0 : index
    %47 = vector.load %arg4[%c0_16, %c0_17, %c0_18] : memref<1x8x1024xf32, #tpu.memory_space<vmem>>, vector<1x8x1024xf32>
    %48 = vector.shape_cast %47 : vector<1x8x1024xf32> to vector<8x1024xf32>
    %49 = vector.broadcast %28 : f32 to vector<8x1024xf32>
    %50 = arith.mulf %49, %48 : vector<8x1024xf32>
    %51 = arith.addf %46, %50 : vector<8x1024xf32>
    %c0_19 = arith.constant 0 : index
    %c0_20 = arith.constant 0 : index
    %52 = vector.load %arg8[%c0_19, %c0_20] : memref<8x1024xf32, #tpu.memory_space<vmem>>, vector<8x1024xf32>
    tpu.vector_store %arg8[%c0_19, %c0_20], %51 {strides = array<i32>} : memref<8x1024xf32, #tpu.memory_space<vmem>>, vector<8x1024xf32>,
    %c9_i32 = arith.constant 9 : i32
    %53 = arith.cmpi eq, %arg0, %c9_i32 : i32
    %54 = arith.extui %53 : i1 to i32
    %c0_i32_21 = arith.constant 0 : i32
    %55 = arith.cmpi ne, %54, %c0_i32_21 : i32
    scf.if %55 {
      %c0_22 = arith.constant 0 : index
      %c0_23 = arith.constant 0 : index
      %56 = vector.load %arg9[%c0_22, %c0_23] : memref<8x1024xf32, #tpu.memory_space<vmem>>, vector<8x1024xf32>
      tpu.vector_store %arg9[%c0_22, %c0_23], %18 {strides = array<i32>} : memref<8x1024xf32, #tpu.memory_space<vmem>>, vector<8x1024xf32>,
      %c0_24 = arith.constant 0 : index
      %c0_25 = arith.constant 0 : index
      %57 = vector.load %arg10[%c0_24, %c0_25] : memref<8x1024xf32, #tpu.memory_space<vmem>>, vector<8x1024xf32>
      tpu.vector_store %arg10[%c0_24, %c0_25], %22 {strides = array<i32>} : memref<8x1024xf32, #tpu.memory_space<vmem>>, vector<8x1024xf32>,
    } else {
    }
    return
  }
  func.func @transform_0(%arg0: i32, %arg1: memref<10x8xf32, #tpu.memory_space<smem>>) -> (i32, i32, i32) {
    %c0_i32 = arith.constant 0 : i32
    %c0_i32_0 = arith.constant 0 : i32
    %c0_i32_1 = arith.constant 0 : i32
    return %arg0, %c0_i32, %c0_i32_0 : i32, i32, i32
  }
  func.func @transform_1(%arg0: i32, %arg1: memref<10x8xf32, #tpu.memory_space<smem>>) -> (i32, i32) {
    %c0_i32 = arith.constant 0 : i32
    %c0_i32_0 = arith.constant 0 : i32
    %c0_i32_1 = arith.constant 0 : i32
    return %c0_i32, %c0_i32_0 : i32, i32
  }
  func.func @transform_2(%arg0: i32, %arg1: memref<10x8xf32, #tpu.memory_space<smem>>) -> (i32, i32, i32) {
    %c0_i32 = arith.constant 0 : i32
    %c0_i32_0 = arith.constant 0 : i32
    %c0_i32_1 = arith.constant 0 : i32
    return %arg0, %c0_i32, %c0_i32_0 : i32, i32, i32
  }
  func.func @transform_3(%arg0: i32, %arg1: memref<10x8xf32, #tpu.memory_space<smem>>) -> (i32, i32) {
    %c0_i32 = arith.constant 0 : i32
    %c0_i32_0 = arith.constant 0 : i32
    %c0_i32_1 = arith.constant 0 : i32
    return %c0_i32, %c0_i32_0 : i32, i32
  }
  func.func @transform_4(%arg0: i32, %arg1: memref<10x8xf32, #tpu.memory_space<smem>>) -> (i32, i32) {
    %c0_i32 = arith.constant 0 : i32
    %c0_i32_0 = arith.constant 0 : i32
    %c0_i32_1 = arith.constant 0 : i32
    return %c0_i32, %c0_i32_0 : i32, i32
  }
  func.func @transform_5(%arg0: i32, %arg1: memref<10x8xf32, #tpu.memory_space<smem>>) -> (i32, i32) {
    %c0_i32 = arith.constant 0 : i32
    %c0_i32_0 = arith.constant 0 : i32
    %c0_i32_1 = arith.constant 0 : i32
    return %c0_i32, %c0_i32_0 : i32, i32
  }
  func.func @transform_6(%arg0: i32, %arg1: memref<10x8xf32, #tpu.memory_space<smem>>) -> (i32, i32) {
    %c0_i32 = arith.constant 0 : i32
    %c0_i32_0 = arith.constant 0 : i32
    %c0_i32_1 = arith.constant 0 : i32
    return %c0_i32, %c0_i32_0 : i32, i32
  }
  func.func @transform_7(%arg0: i32, %arg1: memref<10x8xf32, #tpu.memory_space<smem>>) -> (i32, i32) {
    %c0_i32 = arith.constant 0 : i32
    %c0_i32_0 = arith.constant 0 : i32
    %c0_i32_1 = arith.constant 0 : i32
    return %c0_i32, %c0_i32_0 : i32, i32
  }
  func.func @transform_8(%arg0: i32, %arg1: memref<10x8xf32, #tpu.memory_space<smem>>) -> (i32, i32) {
    %c0_i32 = arith.constant 0 : i32
    %c0_i32_0 = arith.constant 0 : i32
    %c0_i32_1 = arith.constant 0 : i32
    return %c0_i32, %c0_i32_0 : i32, i32
  }
}

</mosaic_0001>

<bundles_post_ra>
// kernel: tpu_custom_call.1
= control target key start
LH: loop header
LB: loop body
LE: loop exit
PB: predicated region body
PF: predicated region fallthrough
CT: control target
= control target key end

     0   :  { %s5149_s0 = inlined_call_operand.vmem [shape: f32[10,8], index: 0, kind: input, shape index: {}]   ;;  %s5150_s1 = inlined_call_operand.vmem [shape: f32[10,1,256], index: 1, kind: input, shape index: {}]   ;;  %s5151_s2 = inlined_call_operand.hbm [shape: f32[8,1024], index: 2, kind: input, shape index: {}]   ;;  %s5152_s3 = inlined_call_operand.hbm [shape: f32[10,8,1024], index: 3, kind: input, shape index: {}]   ;;  %s5153_s4 = inlined_call_operand.hbm [shape: bf16[1024,256], index: 4, kind: input, shape index: {}]   ;;  %s5154_s5 = inlined_call_operand.hbm [shape: bf16[256,2048], index: 5, kind: input, shape index: {}]   ;;  %s5155_s6 = inlined_call_operand.vmem [shape: f32[1,2048], index: 6, kind: input, shape index: {}]   ;;  %s5156_s7 = inlined_call_operand.hbm [shape: f32[8,1024], index: 7, kind: output, shape index: {0}]   ;;  %s5157_s8 = inlined_call_operand.hbm [shape: f32[8,1024], index: 8, kind: output, shape index: {1}]   ;;  %s5158_s9 = inlined_call_operand.hbm [shape: f32[8,1024], index: 9, kind: output, shape index: {2}]  }
   0x1   :  { %s15_s11 = sshll.u32 %s5149_s0, 4  ;;  %s16_s11 = int_to_ptr.vmem [resolvable:$true] %s15_s11 }
   0x2   :  { %s4343_s12 = scalar_lea.vmem %s16_s11, 256  ;;  %p4348_p1 = scmp.lt.s32.totalorder %s16_s11, %s16_s11 }
   0x3   :  { %p4344_p0 = scmp.ne.s32.totalorder %s16_s11, %s4343_s12  ;;  %p4349_p2 = scmp.lt.s32.totalorder %s4343_s12, %s4343_s12 }
   0x5   :  { %p4350_p3 = por %p4349_p2, %p4348_p1 }
   0x7   :  { %p4351_p4 = pnand %p4350_p3, %p4344_p0 }
   0x9   :  { %4354 = shalt.err (!%p4351_p4)  }
   0xa   :  { %s4605_s13 = smov [#allocation3]  }
   0xb   :  { %18 = dma.vmem_to_smem %s16_s11, 256, %s4605_s13, [#allocation2] }
   0xc   :  { %4563 = dma.done.wait [#allocation2], 256 }
   0xd   :  { %4564 = vsyncadd [#allocation2], 4294967040 }
   0xe   :  { %20 = sfence }
   0xf   :  { %21 = vsyncpa [#allocation5], 0 }
  0x10   :  { %22 = vsyncpa [#allocation8], 0 }
  0x11   :  { %24 = vsyncpa [#allocation8 + $0x1], 0 }
  0x12   :  { %25 = vsyncpa [#allocation11], 0 }
  0x13   :  { %26 = vsyncpa [#allocation6], 0 }
  0x14   :  { %27 = vsyncpa [#allocation14], 0  ;;  %s4670_s0 = smov 0   ;;  %s4672_s14 = smov 0  }
  0x15   :  { %s4674_s15 = smov 0   ;;  %s4676_s16 = smov 0  }
  0x16 LB: > { %s4689_s17 = sadd.s32 4294967295, %s4603_s16   ;;  %p100_p5 = scmp.ne.s32.totalorder %s4595_s14, %s4591_s0  ;;  %s4603_s16 = sphi %s4676_s16, %s5179_s16   ;;  %s4599_s15 = sphi %s4674_s15, %s5178_s15   ;;  %s4595_s14 = sphi %s4672_s14, %s5177_s14   ;;  %s4591_s0 = sphi %s4670_s0, %s5176_s0  }
  0x17   : > { %p5159_p6 = scmp.eq.s32.totalorder %s4689_s17, 0  ;;  %p3595_p7 = scmp.ge.s32.totalorder %s4603_s16, 1 }
  0x18   : > { %p237_p8 = scmp.lt.s32.totalorder %s4603_s16, 11  ;;  %s4606_s20 = smov [#allocation9]  }
  0x19   : > { %p4698_p10 = por %p5159_p6, %p100_p5  ;;  %s260_s21 = sshll.u32 %s4606_s20, 4  ;;  %s4706_s21 = int_to_ptr.vmem [resolvable:$true] %s260_s21 }
  0x1a   : > { %p4702_p11 = pnand %p3595_p7, %p237_p8  ;;  %s4607_s23 = smov [#allocation4]  }
  0x1b   : > { %s5162_s18 = scalar_select %p4698_p10, 1, 0 }
  0x1c   : > { %s5163_s19 = scalar_select %p4702_p11, 1, 0 }
  0x1d   : > { %p4053_p12 = pneg %p4702_p11  ;;  %s250_s24 = sshll.u32 %s4607_s23, 4  ;;  %s4716_s24 = int_to_ptr.vmem [resolvable:$true] %s250_s24 }
  0x1e   : > { %s4608_s25 = smov [#allocation10]   ;;  %s4355_s29 = scalar_lea.hbm %s5153_s4, 16384 }
  0x1f   : > { %p4712_p13 = pnand %p4053_p12, %p5159_p6  ;;  %s4718_s26 = sshll.u32 %s4608_s25, 4  ;;  %s274_s26 = int_to_ptr.vmem [resolvable:$true] %s4718_s26 }
  0x20   : > { %p4356_p0 = scmp.ne.s32.totalorder %s5153_s4, %s4355_s29  ;;  %p4362_p4 = scmp.lt.u32.totalorder %s4355_s29, %s5153_s4 }
  0x21   : > { %p4728_p1 = pneg %p4712_p13 }
  0x23   : > { %p4358_p2 = pnand %p4728_p1, %p4356_p0 }
  0x25   : > { %p4359_p3 = pneg %p4358_p2 }
  0x27   : > { %p4364_p5 = pnand %p4362_p4, %p4359_p3 }
  0x29   : > { %4367 = shalt.err (!%p4364_p5)
}
  0x2a   : > { %s4368_s0 = scalar_lea.vmem %s4706_s21, 16384  ;;  %p4376_p9 = scmp.lt.s32.totalorder %s4706_s21, %s4706_s21 }
  0x2b   : > { %p4369_p7 = scmp.ne.s32.totalorder %s4706_s21, %s4368_s0  ;;  %p4377_p6 = scmp.lt.s32.totalorder %s4368_s0, %s4368_s0 }
  0x2d   : > { %p4371_p8 = pnand %p4369_p7, %p4728_p1  ;;  %p4378_p0 = por %p4377_p6, %p4376_p9 }
  0x2f   : > { %p4372_p12 = pneg %p4371_p8 }
  0x31   : > { %p4379_p2 = pnand %p4378_p0, %p4372_p12 }
  0x33   : > { %4382 = shalt.err (!%p4379_p2)
}
  0x34   : > { %s4609_s20 = smov 128   ;;  %s4610_s23 = smov 8  }
  0x35   : > { %4059 = dma.hbm_to_vmem [thread:$0]  (!%p4712_p13), %s5153_s4, 16384, %s4706_s21, [#allocation8], %s4609_s20, %s4609_s20, %s4610_s23  }
  0x36   : > { %s4383_s30 = scalar_lea.hbm %s5151_s2, 1024 }
  0x37   : > { %p4384_p6 = scmp.ne.s32.totalorder %s5151_s2, %s4383_s30  ;;  %p4390_p4 = scmp.lt.u32.totalorder %s4383_s30, %s5151_s2 }
  0x39   : > { %p4386_p9 = pnand %p4384_p6, %p4728_p1 }
  0x3b   : > { %p4387_p3 = pneg %p4386_p9 }
  0x3d   : > { %p4392_p5 = pnand %p4390_p4, %p4387_p3 }
  0x3f   : > { %4395 = shalt.err (!%p4392_p5)
}
  0x40   : > { %s4396_s21 = scalar_lea.vmem %s4716_s24, 1024  ;;  %p4404_p0 = scmp.lt.s32.totalorder %s4716_s24, %s4716_s24 }
  0x41   : > { %p4397_p7 = scmp.ne.s32.totalorder %s4716_s24, %s4396_s21  ;;  %p4405_p2 = scmp.lt.s32.totalorder %s4396_s21, %s4396_s21 }
  0x43   : > { %p4399_p8 = pnand %p4397_p7, %p4728_p1  ;;  %p4406_p6 = por %p4405_p2, %p4404_p0 }
  0x45   : > { %p4400_p12 = pneg %p4399_p8 }
  0x47   : > { %p4407_p9 = pnand %p4406_p6, %p4400_p12 }
  0x49   : > { %4410 = shalt.err (!%p4407_p9)
}
  0x4a   : > { %4056 = dma.hbm_to_vmem [thread:$0]  (!%p4712_p13), %s5151_s2, 1024, %s4716_s24, [#allocation5]  }
  0x4b   : > { %s4411_s28 = scalar_lea.hbm %s5154_s5, 32768 }
  0x4c   : > { %p4412_p3 = scmp.ne.s32.totalorder %s5154_s5, %s4411_s28  ;;  %p4418_p7 = scmp.lt.u32.totalorder %s4411_s28, %s5154_s5 }
  0x4e   : > { %p4414_p4 = pnand %p4412_p3, %p4728_p1 }
  0x50   : > { %p4415_p5 = pneg %p4414_p4 }
  0x52   : > { %p4420_p8 = pnand %p4418_p7, %p4415_p5 }
  0x54   : > { %4423 = shalt.err (!%p4420_p8)
}
  0x55   : > { %s4424_s13 = scalar_lea.vmem %s274_s26, 32768  ;;  %p4432_p6 = scmp.lt.s32.totalorder %s274_s26, %s274_s26 }
  0x56   : > { %p4425_p12 = scmp.ne.s32.totalorder %s274_s26, %s4424_s13  ;;  %p4433_p9 = scmp.lt.s32.totalorder %s4424_s13, %s4424_s13 }
  0x58   : > { %p4427_p0 = pnand %p4425_p12, %p4728_p1  ;;  %p4434_p10 = por %p4433_p9, %p4432_p6 }
  0x5a   : > { %p4428_p2 = pneg %p4427_p0 }
  0x5c   : > { %p4435_p11 = pnand %p4434_p10, %p4428_p2 }
  0x5e   : > { %4438 = shalt.err (!%p4435_p11)
}
  0x5f   : > { %s4611_s24 = smov 1024   ;;  %s4612_s11 = smov 64  }
  0x60   : > { %4062 = dma.hbm_to_vmem [thread:$0]  (!%p4712_p13), %s5154_s5, 32768, %s274_s26, [#allocation11], %s4611_s24, %s4611_s24, %s4612_s11  }
  0x61   : > { %s4792_s20 = sadd.s32 1, %s4603_s16   ;;  %s87_s25 = sadd.s32 1, %s4599_s15 }
  0x62   : > { %s84_s23 = ssub.s32 %s4603_s16, %s4792_s20  ;;  %p94_p11 = scmp.ne.s32.totalorder %s4599_s15, %s4595_s14 }
  0x63   : > { %p85_p10 = scmp.eq.s32.totalorder %s84_s23, 0  ;;  %p95_p1 = scmp.eq.s32.totalorder %s4603_s16, 0 }
  0x64   : > { %p4070_p3 = scmp.lt.s32.totalorder %s4603_s16, 10  ;;  %s297_s28 = sand.u32 1, %s4603_s16  }
  0x65   : > { %s4802_s27 = scalar_select %p85_p10, %s4599_s15, %s87_s25  }
  0x66   : > { %p96_p4 = por %p95_p1, %p94_p11  ;;  %s299_s29 = sand.u32 1, %s4599_s15  }
  0x67   : > { %s3600_s30 = sshll.u32 %s299_s29, 6  ;;  %s4012_s22 = sshll.u32 %s4603_s16, 10 }
  0x68   : > { %s4810_s26 = scalar_lea.hbm %s5152_s3, %s4012_s22  ;;  %s301_s13 = scalar_lea.vmem [#allocation7], %s3600_s30 }
  0x69   : > { %s309_s24 = sshll.u32 %s301_s13, 4  ;;  %p4812_p13 = pnand %p4070_p3, %p96_p4  ;;  %s4816_s24 = int_to_ptr.vmem [resolvable:$true] %s309_s24 }
  0x6a   : > { %s298_s16 = scalar_lea.sflag [#allocation8], %s297_s28  ;;  %s4439_s0 = scalar_lea.hbm %s4810_s26, 1024 }
  0x6b   : > { %p4440_p5 = scmp.ne.s32.totalorder %s4810_s26, %s4439_s0  ;;  %p4441_p7 = pneg %p4812_p13 }
  0x6c   : > { %s4444_s25 = scalar_lea.hbm %s5152_s3, 10240  ;;  %p4445_p0 = scmp.lt.u32.totalorder %s4810_s26, %s5152_s3 }
  0x6d   : > { %p4442_p8 = pnand %p4441_p7, %p4440_p5  ;;  %p4446_p2 = scmp.lt.u32.totalorder %s4444_s25, %s4439_s0 }
  0x6e   : > { %p4448_p9 = scmp.lt.u32.totalorder %s4439_s0, %s4810_s26 }
  0x6f   : > { %p4443_p12 = pneg %p4442_p8  ;;  %p4447_p6 = por %p4446_p2, %p4445_p0 }
  0x71   : > { %p4449_p10 = por %p4448_p9, %p4447_p6 }
  0x73   : > { %p4450_p11 = pnand %p4449_p10, %p4443_p12 }
  0x75   : > { %4453 = shalt.err (!%p4450_p11)
}
  0x76   : > { %s4454_s28 = scalar_lea.vmem %s4816_s24, 1024  ;;  %s4613_s22 = smov [#allocation7]  }
  0x77   : > { %p4455_p1 = scmp.ne.s32.totalorder %s4816_s24, %s4454_s28  ;;  %s4459_s10 = sshll.u32 %s4613_s22, 4  ;;  %s4460_s10 = int_to_ptr.vmem [resolvable:$false] %s4459_s10 }
  0x78   : > { %s4461_s12 = scalar_lea.vmem %s4460_s10, 2048  ;;  %p4462_p5 = scmp.lt.s32.totalorder %s4816_s24, %s4460_s10 }
  0x79   : > { %p4457_p3 = pnand %p4455_p1, %p4441_p7  ;;  %p4463_p8 = scmp.lt.s32.totalorder %s4461_s12, %s4454_s28 }
  0x7b   : > { %p4458_p4 = pneg %p4457_p3  ;;  %p4464_p0 = por %p4463_p8, %p4462_p5 }
  0x7d   : > { %p4465_p2 = pnand %p4464_p0, %p4458_p4 }
  0x7f   : > { %4468 = shalt.err (!%p4465_p2)
}
  0x80   : > { %4066 = dma.hbm_to_vmem [thread:$0]  (!%p4812_p13), %s4810_s26, 1024, %s4816_s24, %s298_s16  }
  0x81   : > { %p5167_p12 = scmp.ne.s32.totalorder %s5163_s19, 0 }
  0x82   : > { %p5168_p7 = scmp.eq.s32.totalorder (!%p5167_p12), %s4689_s17, 0 }
  0x83   : > { %318 = sbr.rel (%p5167_p12) target bundleno = 1266 (0x4f2), region = 44 }
  0x8a   : > { %4566 = dma.done.wait (%p5168_p7), [#allocation5], 1024   ;;  %p5169_p6 = pmov %p5168_p7 }
  0x8b   : > { %s324_s13 = sand.u32 1, %s4689_s17   ;;  %s326_s0 = sand.u32 1, %s4595_s14  }
  0x8c   : > { %4568 = vsyncadd (%p5169_p6), [#allocation5], 4294966272  ;;  %s3605_s21 = sshll.u32 %s326_s0, 6  ;;  %s325_s23 = scalar_lea.sflag [#allocation8], %s324_s13 }
  0x8d   : > { %s4851_s11 = scalar_lea.vmem [#allocation7], %s3605_s21  ;;  %p5170_p9 = scmp.ne.s32.totalorder %s5162_s18, 0 }
  0x8f   : > { %4570 = dma.done.wait (%p5170_p9), %s325_s23, 1024  }
  0x90   : > { %4572 = vsyncadd (%p5170_p9), %s325_s23, 4294966272  ;;  %p5171_p13 = pmov %p5169_p6 }
  0x91   : > { %p5172_p10 = pmov %p5169_p6 }
  0x92   : > { %4574 = dma.done.wait (%p5171_p13), [#allocation8], 16384  }
  0x93   : > { %4576 = vsyncadd (%p5172_p10), [#allocation8], 4294950912  ;;  %p5173_p11 = pmov %p5169_p6 }
  0x94   : > { %p5174_p1 = pmov %p5169_p6 }
  0x95   : > { %4578 = dma.done.wait (%p5173_p11), [#allocation11], 32768  }
  0x96   : > { %4580 = vsyncadd (%p5174_p1), [#allocation11], 4294934528  ;;  %p368_p3 = scmp.lt.s32.totalorder %s4689_s17, 9  ;;  %p5175_p4 = scmp.ne.s32.totalorder %s4689_s17, 0 }
  0x97   : > { %v376_v0 = vld [vmem:[#allocation4] sm:$0xff] (!%p5175_p4)  ;;  %v377_v1 = vld [vmem:[#allocation4 + $0x8] sm:$0xff] (!%p5175_p4)  ;;  %v378_v2 = vld [vmem:[#allocation4 + $0x10] sm:$0xff] (!%p5175_p4) }
  0x98   : > { %s369_s19 = scalar_select %p368_p3, %s4689_s17, 9 }
  0x99   : > { %375 = sbr.rel (%p5175_p4) target bundleno = 160 (0xa0), region = 64  ;;  %384 = vst [vmem:[#allocation12] sm:$0xff] (!%p5175_p4), %v376_v0  ;;  %385 = vst [vmem:[#allocation12 + $0x8] sm:$0xff] (!%p5175_p4), %v377_v1  ;;  %v379_v3 = vld [vmem:[#allocation4 + $0x18] sm:$0xff] (!%p5175_p4)  ;;  %v380_v4 = vld [vmem:[#allocation4 + $0x20] sm:$0xff] (!%p5175_p4) }
  0x9a   : > { %s3608_s26 = sshll.u32 %s369_s19, 1  ;;  %386 = vst [vmem:[#allocation12 + $0x10] sm:$0xff] (!%p5175_p4), %v378_v2  ;;  %v381_v5 = vld [vmem:[#allocation4 + $0x28] sm:$0xff] (!%p5175_p4)  ;;  %387 = vst [vmem:[#allocation12 + $0x18] sm:$0xff] (!%p5175_p4), %v379_v3  ;;  %v382_v6 = vld [vmem:[#allocation4 + $0x30] sm:$0xff] (!%p5175_p4) }
  0x9b   : > { %s4870_s16 = scalar_lea.vmem %s5150_s1, %s3608_s26  ;;  %388 = vst [vmem:[#allocation12 + $0x20] sm:$0xff] (!%p5175_p4), %v380_v4  ;;  %389 = vst [vmem:[#allocation12 + $0x28] sm:$0xff] (!%p5175_p4), %v381_v5  ;;  %v383_v7 = vld [vmem:[#allocation4 + $0x38] sm:$0xff] (!%p5175_p4) }
  0x9c   : > { %390 = vst [vmem:[#allocation12 + $0x30] sm:$0xff] (!%p5175_p4), %v382_v6  ;;  %391 = vst [vmem:[#allocation12 + $0x38] sm:$0xff] (!%p5175_p4), %v383_v7 }
  0xa0 PF: > { %v4123_v8 = vld [vmem:[#allocation9 + $0x4] ss:$8 sps:$4 sm:$0xff]   ;;  %v4125_v9 = vld [vmem:[#allocation9] ss:$8 sps:$4 sm:$0xff]   ;;  %v4126_v10 = vld [vmem:[#allocation9 + $0x14] ss:$8 sps:$4 sm:$0xff]  }
  0xa1   : > { %1188 = vmatprep.subr.bf16.mxu0 %v4123_v8  ;;  %v4128_v11 = vld [vmem:[#allocation9 + $0x10] ss:$8 sps:$4 sm:$0xff]   ;;  %v4129_v12 = vld [vmem:[#allocation9 + $0x24] ss:$8 sps:$4 sm:$0xff]   ;;  %v4131_v13 = vld [vmem:[#allocation9 + $0x20] ss:$8 sps:$4 sm:$0xff]  }
  0xa2   : > { %1189 = vmatpush1.bf16.msra.mxu0 %v4125_v9  ;;  %v4132_v14 = vld [vmem:[#allocation9 + $0x34] ss:$8 sps:$4 sm:$0xff]   ;;  %v4134_v15 = vld [vmem:[#allocation9 + $0x30] ss:$8 sps:$4 sm:$0xff]   ;;  %v4135_v16 = vld [vmem:[#allocation9 + $0x44] ss:$8 sps:$4 sm:$0xff]  }
  0xa3   : > { %1190 = vmatprep.subr.bf16.mxu0 %v4126_v10  ;;  %v4137_v17 = vld [vmem:[#allocation9 + $0x40] ss:$8 sps:$4 sm:$0xff]   ;;  %v4138_v18 = vld [vmem:[#allocation9 + $0x54] ss:$8 sps:$4 sm:$0xff]   ;;  %v4140_v19 = vld [vmem:[#allocation9 + $0x50] ss:$8 sps:$4 sm:$0xff]  }
  0xa4   : > { %v4141_v20 = vld [vmem:[#allocation9 + $0x64] ss:$8 sps:$4 sm:$0xff]   ;;  %v4143_v23 = vld [vmem:[#allocation9 + $0x60] ss:$8 sps:$4 sm:$0xff]   ;;  %v4144_v24 = vld [vmem:[#allocation9 + $0x74] ss:$8 sps:$4 sm:$0xff]  }
  0xa5   : > { %v393_v21 = vld [vmem:[#allocation12 + $0x8] sm:$0xff]  ;;  %v4146_v25 = vld [vmem:[#allocation9 + $0x70] ss:$8 sps:$4 sm:$0xff]   ;;  %v4150_v28 = vld [vmem:[#allocation9 + $0x94] ss:$8 sps:$4 sm:$0xff]   ;;  %s4903_s25 = sshll.u32 %s4689_s17, 7 }
  0xa6   : > { %1191 = vmatpush1.bf16.msra.mxu0 %v4128_v11  ;;  %v401_v22 = vpack.c.bf16 %v393_v21, %v393_v21  ;;  %v4147_v26 = vld [vmem:[#allocation9 + $0x84] ss:$8 sps:$4 sm:$0xff]   ;;  %v4149_v27 = vld [vmem:[#allocation9 + $0x80] ss:$8 sps:$4 sm:$0xff]   ;;  %v4152_v29 = vld [vmem:[#allocation9 + $0x90] ss:$8 sps:$4 sm:$0xff]  }
  0xa7   : > { %1192 = vmatprep.subr.bf16.mxu0 %v4129_v12  ;;  %v4153_v30 = vld [vmem:[#allocation9 + $0xa4] ss:$8 sps:$4 sm:$0xff]   ;;  %v4155_v31 = vld [vmem:[#allocation9 + $0xa0] ss:$8 sps:$4 sm:$0xff]   ;;  %v4156_v32 = vld [vmem:[#allocation9 + $0xb4] ss:$8 sps:$4 sm:$0xff]  }
  0xa8   : > { %1220 = vmatprep.mubr.bf16.mxu0 %v401_v22  ;;  %v4158_v33 = vld [vmem:[#allocation9 + $0xb0] ss:$8 sps:$4 sm:$0xff]   ;;  %v4159_v34 = vld [vmem:[#allocation9 + $0xc4] ss:$8 sps:$4 sm:$0xff]   ;;  %v4161_v35 = vld [vmem:[#allocation9 + $0xc0] ss:$8 sps:$4 sm:$0xff]  }
  0xa9   : > { %v4162_v36 = vld [vmem:[#allocation9 + $0xd4] ss:$8 sps:$4 sm:$0xff]   ;;  %v4164_v37 = vld [vmem:[#allocation9 + $0xd0] ss:$8 sps:$4 sm:$0xff]   ;;  %v4165_v38 = vld [vmem:[#allocation9 + $0xe4] ss:$8 sps:$4 sm:$0xff]  }
  0xaa   : > { %1193 = vmatpush1.bf16.msra.mxu0 %v4131_v13  ;;  %v4167_v39 = vld [vmem:[#allocation9 + $0xe0] ss:$8 sps:$4 sm:$0xff]   ;;  %v4168_v40 = vld [vmem:[#allocation9 + $0xf4] ss:$8 sps:$4 sm:$0xff]   ;;  %v4170_v41 = vld [vmem:[#allocation9 + $0xf0] ss:$8 sps:$4 sm:$0xff]  }
  0xab   : > { %1194 = vmatprep.subr.bf16.mxu0 %v4132_v14  ;;  %v4173_v42 = vld [vmem:[#allocation9 + $0x104] ss:$8 sps:$4 sm:$0xff]   ;;  %v395_v44 = vld [vmem:[#allocation12 + $0x18] sm:$0xff]  ;;  %v4171_v46 = vld [vmem:[#allocation9 + $0x100] ss:$8 sps:$4 sm:$0xff]   ;;  %s3322_s29 = sadd.s32 1, %s4903_s25 }
  0xac   : > { %v392_v43 = vld [vmem:[#allocation12] sm:$0xff]  ;;  %v403_v47 = vpack.c.bf16 %v395_v44, %v395_v44  ;;  %v4176_v48 = vld [vmem:[#allocation9 + $0x114] ss:$8 sps:$4 sm:$0xff]   ;;  %v4174_v49 = vld [vmem:[#allocation9 + $0x110] ss:$8 sps:$4 sm:$0xff]   ;;  %s3321_s30 = sld [smem:[#allocation3 + %s4903_s25]] }
  0xad   : > { %v400_v45 = vpack.c.bf16 %v392_v43, %v392_v43  ;;  %v4179_v50 = vld [vmem:[#allocation9 + $0x124] ss:$8 sps:$4 sm:$0xff]   ;;  %v4177_v51 = vld [vmem:[#allocation9 + $0x120] ss:$8 sps:$4 sm:$0xff]   ;;  %v4182_v52 = vld [vmem:[#allocation9 + $0x134] ss:$8 sps:$4 sm:$0xff]  }
  0xae   : > { %1195 = vmatpush1.bf16.msra.mxu0 %v4134_v15  ;;  %v4180_v53 = vld [vmem:[#allocation9 + $0x130] ss:$8 sps:$4 sm:$0xff]   ;;  %v4185_v54 = vld [vmem:[#allocation9 + $0x144] ss:$8 sps:$4 sm:$0xff]   ;;  %v4183_v55 = vld [vmem:[#allocation9 + $0x140] ss:$8 sps:$4 sm:$0xff]  }
  0xaf   : > { %1196 = vmatprep.subr.bf16.mxu0 %v4135_v16  ;;  %v4188_v56 = vld [vmem:[#allocation9 + $0x154] ss:$8 sps:$4 sm:$0xff]   ;;  %v4186_v57 = vld [vmem:[#allocation9 + $0x150] ss:$8 sps:$4 sm:$0xff]   ;;  %v4191_v58 = vld [vmem:[#allocation9 + $0x164] ss:$8 sps:$4 sm:$0xff]  }
  0xb0   : > { %v4189_v59 = vld [vmem:[#allocation9 + $0x160] ss:$8 sps:$4 sm:$0xff]   ;;  %v4194_v60 = vld [vmem:[#allocation9 + $0x174] ss:$8 sps:$4 sm:$0xff]   ;;  %v4192_v61 = vld [vmem:[#allocation9 + $0x170] ss:$8 sps:$4 sm:$0xff]  }
  0xb1   : > { %v4197_v62 = vld [vmem:[#allocation9 + $0x184] ss:$8 sps:$4 sm:$0xff]   ;;  %v4195_v63 = vld [vmem:[#allocation9 + $0x180] ss:$8 sps:$4 sm:$0xff]   ;;  %v4200_v0 = vld [vmem:[#allocation9 + $0x194] ss:$8 sps:$4 sm:$0xff]  }
  0xb2   : > { %1197 = vmatpush1.bf16.msra.mxu0 %v4137_v17  ;;  %v4198_v1 = vld [vmem:[#allocation9 + $0x190] ss:$8 sps:$4 sm:$0xff]   ;;  %v4203_v2 = vld [vmem:[#allocation9 + $0x1a4] ss:$8 sps:$4 sm:$0xff]   ;;  %v4201_v3 = vld [vmem:[#allocation9 + $0x1a0] ss:$8 sps:$4 sm:$0xff]  }
  0xb3   : > { %1198 = vmatprep.subr.bf16.mxu0 %v4138_v18  ;;  %v4206_v4 = vld [vmem:[#allocation9 + $0x1b4] ss:$8 sps:$4 sm:$0xff]   ;;  %v4204_v5 = vld [vmem:[#allocation9 + $0x1b0] ss:$8 sps:$4 sm:$0xff]   ;;  %v4209_v6 = vld [vmem:[#allocation9 + $0x1c4] ss:$8 sps:$4 sm:$0xff]  }
  0xb4   : > { %v4207_v7 = vld [vmem:[#allocation9 + $0x1c0] ss:$8 sps:$4 sm:$0xff]   ;;  %v4212_v8 = vld [vmem:[#allocation9 + $0x1d4] ss:$8 sps:$4 sm:$0xff]   ;;  %v4210_v9 = vld [vmem:[#allocation9 + $0x1d0] ss:$8 sps:$4 sm:$0xff]  }
  0xb5   : > { %v4215_v10 = vld [vmem:[#allocation9 + $0x1e4] ss:$8 sps:$4 sm:$0xff]   ;;  %v4213_v11 = vld [vmem:[#allocation9 + $0x1e0] ss:$8 sps:$4 sm:$0xff]   ;;  %v4218_v12 = vld [vmem:[#allocation9 + $0x1f4] ss:$8 sps:$4 sm:$0xff]  }
  0xb6   : > { %1199 = vmatpush1.bf16.msra.mxu0 %v4140_v19  ;;  %v4216_v13 = vld [vmem:[#allocation9 + $0x1f0] ss:$8 sps:$4 sm:$0xff]   ;;  %v4221_v15 = vld [vmem:[#allocation9 + $0x204] ss:$8 sps:$4 sm:$0xff]   ;;  %v4219_v18 = vld [vmem:[#allocation9 + $0x200] ss:$8 sps:$4 sm:$0xff]  }
  0xb7   : > { %1200 = vmatprep.subr.bf16.mxu0 %v4141_v20  ;;  %v394_v14 = vld [vmem:[#allocation12 + $0x10] sm:$0xff]  ;;  %v397_v16 = vld [vmem:[#allocation12 + $0x28] sm:$0xff]  ;;  %v1356_v21 = vld [vmem:[#allocation10] sm:$0xff]  ;;  %s3323_s28 = sld [smem:[#allocation3 + %s3322_s29]]  ;;  %s3328_s22 = sadd.s32 4, %s4903_s25 }
  0xb8   : > { %v402_v17 = vpack.c.bf16 %v394_v14, %v394_v14  ;;  %v405_v19 = vpack.c.bf16 %v397_v16, %v397_v16  ;;  %v4224_v20 = vld [vmem:[#allocation9 + $0x214] ss:$8 sps:$4 sm:$0xff]   ;;  %v1364_v22 = vld [vmem:[#allocation10 + $0x40] sm:$0xff]  ;;  %s3324_s21 = sadd.s32 2, %s4903_s25  ;;  %s3326_s23 = sadd.s32 3, %s4903_s25 }
  0xb9   : > { %v4231_v43 = vld [vmem:[#allocation9 + $0x240] ss:$8 sps:$4 sm:$0xff]   ;;  %s4920_s19 = sld [smem:[#allocation3 + %s3328_s22]]  ;;  %p4003_p5 = scmp.ne.s32.totalorder %s4689_s17, 9 }
  0xba   : > { %1201 = vmatpush1.bf16.msra.mxu0 %v4143_v23  ;;  %v4222_v23 = vld [vmem:[#allocation9 + $0x210] ss:$8 sps:$4 sm:$0xff]   ;;  %v1420_v44 = vld [vmem:[#allocation10 + $0x200] sm:$0xff]  ;;  %s4926_s26 = sld [smem:[#allocation3 + %s3324_s21]] }
  0xbb   : > { %1202 = vmatprep.subr.bf16.mxu0 %v4144_v24  ;;  %v3739_v24 = vcombine.high %v1356_v21, %v1364_v22  ;;  %v1516_v16 = vld [vmem:[#allocation10 + $0x500] sm:$0xff]  ;;  %s4928_s24 = sld [smem:[#allocation3 + %s3326_s23]] }
  0xbd   : > { %2976 = vmatprep.subr.bf16.mxu1 %v3739_v24  ;;  %v4257_v24 = vld [vmem:[#allocation9 + $0x2c4] ss:$8 sps:$4 sm:$0xff]  }
  0xbe   : > { %1203 = vmatpush1.bf16.msra.mxu0 %v4146_v25  ;;  %v3738_v25 = vcombine.low %v1356_v21, %v1364_v22  ;;  %v4252_v21 = vld [vmem:[#allocation9 + $0x2b0] ss:$8 sps:$4 sm:$0xff]   ;;  %v1532_v22 = vld [vmem:[#allocation10 + $0x580] sm:$0xff] }
  0xbf   : > { %1204 = vmatprep.subr.bf16.mxu0 %v4147_v26  ;;  %v1372_v26 = vld [vmem:[#allocation10 + $0x80] sm:$0xff] }
  0xc0   : > { %2977 = vmatpush1.bf16.msra.mxu1 %v3738_v25 }
  0xc2   : > { %1205 = vmatpush1.bf16.msra.mxu0 %v4149_v27  ;;  %v1380_v27 = vld [vmem:[#allocation10 + $0xc0] sm:$0xff] }
  0xc3   : > { %1206 = vmatprep.subr.bf16.mxu0 %v4150_v28  ;;  %v4227_v28 = vld [vmem:[#allocation9 + $0x224] ss:$8 sps:$4 sm:$0xff]  }
  0xc6   : > { %1207 = vmatpush1.bf16.msra.mxu0 %v4152_v29  ;;  %v3755_v29 = vcombine.high %v1372_v26, %v1380_v27 }
  0xc7   : > { %1208 = vmatprep.subr.bf16.mxu0 %v4153_v30  ;;  %v3754_v30 = vcombine.low %v1372_v26, %v1380_v27  ;;  %v4255_v27 = vld [vmem:[#allocation9 + $0x2c0] ss:$8 sps:$4 sm:$0xff]  }
  0xc8   : > { %2978 = vmatprep.subr.bf16.mxu1 %v3755_v29  ;;  %v4258_v29 = vld [vmem:[#allocation9 + $0x2d0] ss:$8 sps:$4 sm:$0xff]  }
  0xc9   : > { %2979 = vmatpush1.bf16.msra.mxu1 %v3754_v30  ;;  %v4263_v30 = vld [vmem:[#allocation9 + $0x2e4] ss:$8 sps:$4 sm:$0xff]  }
  0xca   : > { %1209 = vmatpush1.bf16.msra.mxu0 %v4155_v31  ;;  %v4225_v31 = vld [vmem:[#allocation9 + $0x220] ss:$8 sps:$4 sm:$0xff]  }
  0xcb   : > { %1210 = vmatprep.subr.bf16.mxu0 %v4156_v32  ;;  %v1388_v32 = vld [vmem:[#allocation10 + $0x100] sm:$0xff] }
  0xce   : > { %1211 = vmatpush1.bf16.msra.mxu0 %v4158_v33  ;;  %v1396_v33 = vld [vmem:[#allocation10 + $0x140] sm:$0xff] }
  0xcf   : > { %1212 = vmatprep.subr.bf16.mxu0 %v4159_v34  ;;  %v4230_v34 = vld [vmem:[#allocation9 + $0x234] ss:$8 sps:$4 sm:$0xff]  }
  0xd2   : > { %1213 = vmatpush1.bf16.msra.mxu0 %v4161_v35  ;;  %v3771_v35 = vcombine.high %v1388_v32, %v1396_v33 }
  0xd3   : > { %1214 = vmatprep.subr.bf16.mxu0 %v4162_v36  ;;  %v3770_v36 = vcombine.low %v1388_v32, %v1396_v33  ;;  %v4266_v32 = vld [vmem:[#allocation9 + $0x2f4] ss:$8 sps:$4 sm:$0xff]   ;;  %v4264_v33 = vld [vmem:[#allocation9 + $0x2f0] ss:$8 sps:$4 sm:$0xff]  }
  0xd4   : > { %2980 = vmatprep.subr.bf16.mxu1 %v3771_v35  ;;  %v4269_v35 = vld [vmem:[#allocation9 + $0x304] ss:$8 sps:$4 sm:$0xff]  }
  0xd5   : > { %2981 = vmatpush1.bf16.msra.mxu1 %v3770_v36  ;;  %v399_v36 = vld [vmem:[#allocation12 + $0x38] sm:$0xff] }
  0xd6   : > { %1215 = vmatpush1.bf16.msra.mxu0 %v4164_v37  ;;  %v4228_v37 = vld [vmem:[#allocation9 + $0x230] ss:$8 sps:$4 sm:$0xff]  }
  0xd7   : > { %1216 = vmatprep.subr.bf16.mxu0 %v4165_v38  ;;  %v1404_v38 = vld [vmem:[#allocation10 + $0x180] sm:$0xff] }
  0xda   : > { %1217 = vmatpush1.bf16.msra.mxu0 %v4167_v39  ;;  %v1412_v39 = vld [vmem:[#allocation10 + $0x1c0] sm:$0xff] }
  0xdb   : > { %1218 = vmatprep.subr.bf16.mxu0 %v4168_v40  ;;  %v4233_v40 = vld [vmem:[#allocation9 + $0x244] ss:$8 sps:$4 sm:$0xff]  }
  0xde   : > { %1219 = vmatpush1.bf16.msra.mxu0 %v4170_v41  ;;  %v3787_v41 = vcombine.high %v1404_v38, %v1412_v39 }
  0xdf   : > { %1229 = vmatprep.subr.bf16.mxu0 %v4173_v42  ;;  %v3786_v42 = vcombine.low %v1404_v38, %v1412_v39  ;;  %v4267_v38 = vld [vmem:[#allocation9 + $0x300] ss:$8 sps:$4 sm:$0xff]   ;;  %v407_v39 = vpack.c.bf16 %v399_v36, %v399_v36 }
  0xe0   : > { %2982 = vmatprep.subr.bf16.mxu1 %v3787_v41  ;;  %v4270_v41 = vld [vmem:[#allocation9 + $0x310] ss:$8 sps:$4 sm:$0xff]   ;;  %v1480_v36 = vld [vmem:[#allocation10 + $0x3e0] sm:$0xff] }
  0xe1   : > { %1221 = vmatmul.mubr.bf16.vlgmr.msra.gmra.mrb[0].mxu0 %v400_v45  ;;  %v1428_v45 = vld [vmem:[#allocation10 + $0x240] sm:$0xff]  ;;  %2983 = vmatpush1.bf16.msra.mxu1 %v3786_v42 }
  0xe2   : > { %1230 = vmatpush1.bf16.msra.mxu0 %v4171_v46  ;;  %1261 = vmatprep.mubr.bf16.mxu0 %v403_v47  ;;  %v4236_v46 = vld [vmem:[#allocation9 + $0x254] ss:$8 sps:$4 sm:$0xff]   ;;  %v3803_v47 = vcombine.high %v1420_v44, %v1428_v45  ;;  %v4275_v42 = vld [vmem:[#allocation9 + $0x324] ss:$8 sps:$4 sm:$0xff]  }
  0xe3   : > { %1231 = vmatprep.subr.bf16.mxu0 %v4176_v48  ;;  %v3802_v48 = vcombine.low %v1420_v44, %v1428_v45  ;;  %v4278_v44 = vld [vmem:[#allocation9 + $0x334] ss:$8 sps:$4 sm:$0xff]   ;;  %v4276_v45 = vld [vmem:[#allocation9 + $0x330] ss:$8 sps:$4 sm:$0xff]  }
  0xe4   : > { %2984 = vmatprep.subr.bf16.mxu1 %v3803_v47  ;;  %v4279_v47 = vld [vmem:[#allocation9 + $0x340] ss:$8 sps:$4 sm:$0xff]  }
  0xe5   : > { %2985 = vmatpush1.bf16.msra.mxu1 %v3802_v48  ;;  %v4284_v48 = vld [vmem:[#allocation9 + $0x354] ss:$8 sps:$4 sm:$0xff]  }
  0xe6   : > { %1232 = vmatpush1.bf16.msra.mxu0 %v4174_v49  ;;  %v4234_v49 = vld [vmem:[#allocation9 + $0x250] ss:$8 sps:$4 sm:$0xff]  }
  0xe7   : > { %1233 = vmatprep.subr.bf16.mxu0 %v4179_v50  ;;  %v1436_v50 = vld [vmem:[#allocation10 + $0x280] sm:$0xff] }
  0xea   : > { %1234 = vmatpush1.bf16.msra.mxu0 %v4177_v51  ;;  %v1444_v51 = vld [vmem:[#allocation10 + $0x2c0] sm:$0xff] }
  0xeb   : > { %1235 = vmatprep.subr.bf16.mxu0 %v4182_v52  ;;  %v4239_v52 = vld [vmem:[#allocation9 + $0x264] ss:$8 sps:$4 sm:$0xff]  }
  0xee   : > { %1236 = vmatpush1.bf16.msra.mxu0 %v4180_v53  ;;  %v3819_v53 = vcombine.high %v1436_v50, %v1444_v51 }
  0xef   : > { %1237 = vmatprep.subr.bf16.mxu0 %v4185_v54  ;;  %v3818_v54 = vcombine.low %v1436_v50, %v1444_v51  ;;  %v4287_v50 = vld [vmem:[#allocation9 + $0x364] ss:$8 sps:$4 sm:$0xff]   ;;  %v4285_v51 = vld [vmem:[#allocation9 + $0x360] ss:$8 sps:$4 sm:$0xff]  }
  0xf0   : > { %2986 = vmatprep.subr.bf16.mxu1 %v3819_v53  ;;  %v4288_v53 = vld [vmem:[#allocation9 + $0x370] ss:$8 sps:$4 sm:$0xff]  }
  0xf1   : > { %2987 = vmatpush1.bf16.msra.mxu1 %v3818_v54  ;;  %v4293_v54 = vld [vmem:[#allocation9 + $0x384] ss:$8 sps:$4 sm:$0xff]  }
  0xf2   : > { %1238 = vmatpush1.bf16.msra.mxu0 %v4183_v55  ;;  %v4237_v55 = vld [vmem:[#allocation9 + $0x260] ss:$8 sps:$4 sm:$0xff]  }
  0xf3   : > { %1239 = vmatprep.subr.bf16.mxu0 %v4188_v56  ;;  %v1452_v56 = vld [vmem:[#allocation10 + $0x300] sm:$0xff] }
  0xf6   : > { %1240 = vmatpush1.bf16.msra.mxu0 %v4186_v57  ;;  %v1460_v57 = vld [vmem:[#allocation10 + $0x340] sm:$0xff] }
  0xf7   : > { %1241 = vmatprep.subr.bf16.mxu0 %v4191_v58  ;;  %v4242_v58 = vld [vmem:[#allocation9 + $0x274] ss:$8 sps:$4 sm:$0xff]  }
  0xfa   : > { %1242 = vmatpush1.bf16.msra.mxu0 %v4189_v59  ;;  %v3835_v59 = vcombine.high %v1452_v56, %v1460_v57 }
  0xfb   : > { %1243 = vmatprep.subr.bf16.mxu0 %v4194_v60  ;;  %v3834_v60 = vcombine.low %v1452_v56, %v1460_v57  ;;  %v4296_v56 = vld [vmem:[#allocation9 + $0x394] ss:$8 sps:$4 sm:$0xff]   ;;  %v4294_v57 = vld [vmem:[#allocation9 + $0x390] ss:$8 sps:$4 sm:$0xff]  }
  0xfc   : > { %2988 = vmatprep.subr.bf16.mxu1 %v3835_v59  ;;  %v4297_v59 = vld [vmem:[#allocation9 + $0x3a0] ss:$8 sps:$4 sm:$0xff]  }
  0xfd   : > { %2989 = vmatpush1.bf16.msra.mxu1 %v3834_v60  ;;  %v4302_v60 = vld [vmem:[#allocation9 + $0x3b4] ss:$8 sps:$4 sm:$0xff]  }
  0xfe   : > { %1244 = vmatpush1.bf16.msra.mxu0 %v4192_v61  ;;  %v4240_v61 = vld [vmem:[#allocation9 + $0x270] ss:$8 sps:$4 sm:$0xff]  }
  0xff   : > { %1245 = vmatprep.subr.bf16.mxu0 %v4197_v62  ;;  %v1468_v62 = vld [vmem:[#allocation10 + $0x380] sm:$0xff] }
 0x102   : > { %1246 = vmatpush1.bf16.msra.mxu0 %v4195_v63  ;;  %v1476_v63 = vld [vmem:[#allocation10 + $0x3c0] sm:$0xff] }
 0x103   : > { %1247 = vmatprep.subr.bf16.mxu0 %v4200_v0  ;;  %v4245_v0 = vld [vmem:[#allocation9 + $0x284] ss:$8 sps:$4 sm:$0xff]  }
 0x106   : > { %1248 = vmatpush1.bf16.msra.mxu0 %v4198_v1  ;;  %v3851_v1 = vcombine.high %v1468_v62, %v1476_v63 }
 0x107   : > { %1249 = vmatprep.subr.bf16.mxu0 %v4203_v2  ;;  %v3850_v2 = vcombine.low %v1468_v62, %v1476_v63  ;;  %v4305_v62 = vld [vmem:[#allocation9 + $0x3c4] ss:$8 sps:$4 sm:$0xff]   ;;  %v4303_v63 = vld [vmem:[#allocation9 + $0x3c0] ss:$8 sps:$4 sm:$0xff]  }
 0x108   : > { %2990 = vmatprep.subr.bf16.mxu1 %v3851_v1  ;;  %v4306_v1 = vld [vmem:[#allocation9 + $0x3d0] ss:$8 sps:$4 sm:$0xff]  }
 0x109   : > { %2991 = vmatpush1.bf16.msra.mxu1 %v3850_v2  ;;  %v4311_v2 = vld [vmem:[#allocation9 + $0x3e4] ss:$8 sps:$4 sm:$0xff]  }
 0x10a   : > { %1250 = vmatpush1.bf16.msra.mxu0 %v4201_v3  ;;  %v4243_v3 = vld [vmem:[#allocation9 + $0x280] ss:$8 sps:$4 sm:$0xff]  }
 0x10b   : > { %1251 = vmatprep.subr.bf16.mxu0 %v4206_v4  ;;  %v1484_v4 = vld [vmem:[#allocation10 + $0x400] sm:$0xff] }
 0x10e   : > { %1252 = vmatpush1.bf16.msra.mxu0 %v4204_v5  ;;  %v1492_v5 = vld [vmem:[#allocation10 + $0x440] sm:$0xff] }
 0x10f   : > { %1253 = vmatprep.subr.bf16.mxu0 %v4209_v6  ;;  %v4248_v6 = vld [vmem:[#allocation9 + $0x294] ss:$8 sps:$4 sm:$0xff]  }
 0x112   : > { %1254 = vmatpush1.bf16.msra.mxu0 %v4207_v7  ;;  %v3867_v7 = vcombine.high %v1484_v4, %v1492_v5 }
 0x113   : > { %1255 = vmatprep.subr.bf16.mxu0 %v4212_v8  ;;  %v3866_v8 = vcombine.low %v1484_v4, %v1492_v5  ;;  %v4314_v4 = vld [vmem:[#allocation9 + $0x3f4] ss:$8 sps:$4 sm:$0xff]   ;;  %v1360_v5 = vld [vmem:[#allocation10 + $0x20] sm:$0xff] }
 0x114   : > { %2992 = vmatprep.subr.bf16.mxu1 %v3867_v7  ;;  %v4312_v7 = vld [vmem:[#allocation9 + $0x3f0] ss:$8 sps:$4 sm:$0xff]  }
 0x115   : > { %2993 = vmatpush1.bf16.msra.mxu1 %v3866_v8  ;;  %v398_v8 = vld [vmem:[#allocation12 + $0x30] sm:$0xff] }
 0x116   : > { %1256 = vmatpush1.bf16.msra.mxu0 %v4210_v9  ;;  %v4246_v9 = vld [vmem:[#allocation9 + $0x290] ss:$8 sps:$4 sm:$0xff]  }
 0x117   : > { %1257 = vmatprep.subr.bf16.mxu0 %v4215_v10  ;;  %v1500_v10 = vld [vmem:[#allocation10 + $0x480] sm:$0xff] }
 0x11a   : > { %1258 = vmatpush1.bf16.msra.mxu0 %v4213_v11  ;;  %v1508_v11 = vld [vmem:[#allocation10 + $0x4c0] sm:$0xff] }
 0x11b   : > { %1259 = vmatprep.subr.bf16.mxu0 %v4218_v12  ;;  %v4251_v12 = vld [vmem:[#allocation9 + $0x2a4] ss:$8 sps:$4 sm:$0xff]   ;;  %v3882_v14 = vcombine.low %v1500_v10, %v1508_v11 }
 0x11e   : > { %1260 = vmatpush1.bf16.msra.mxu0 %v4216_v13  ;;  %v3883_v13 = vcombine.high %v1500_v10, %v1508_v11  ;;  %v1376_v10 = vld [vmem:[#allocation10 + $0xa0] sm:$0xff] }
 0x11f   : > { %1270 = vmatprep.subr.bf16.mxu0 %v4221_v15  ;;  %v4249_v15 = vld [vmem:[#allocation9 + $0x2a0] ss:$8 sps:$4 sm:$0xff]  }
 0x120   : > { %2994 = vmatprep.subr.bf16.mxu1 %v3883_v13  ;;  %v1384_v11 = vld [vmem:[#allocation10 + $0xe0] sm:$0xff] }
 0x121   : > { %1262 = vmatmul.mubr.bf16.vlgmr.msra.gmra.mrb[0].mxu0 %v402_v17  ;;  %v1524_v17 = vld [vmem:[#allocation10 + $0x540] sm:$0xff]  ;;  %2995 = vmatpush1.bf16.msra.mxu1 %v3882_v14  ;;  %v3763_v14 = vcombine.high %v1376_v10, %v1384_v11 }
 0x122   : > { %1271 = vmatpush1.bf16.msra.mxu0 %v4219_v18  ;;  %1302 = vmatprep.mubr.bf16.mxu0 %v405_v19  ;;  %v4254_v18 = vld [vmem:[#allocation9 + $0x2b4] ss:$8 sps:$4 sm:$0xff]   ;;  %v3899_v19 = vcombine.high %v1516_v16, %v1524_v17 }
 0x123   : > { %1272 = vmatprep.subr.bf16.mxu0 %v4224_v20  ;;  %v3898_v20 = vcombine.low %v1516_v16, %v1524_v17  ;;  %v1400_v16 = vld [vmem:[#allocation10 + $0x160] sm:$0xff]  ;;  %v3762_v17 = vcombine.low %v1376_v10, %v1384_v11 }
 0x124   : > { %2996 = vmatprep.subr.bf16.mxu1 %v3899_v19  ;;  %v1408_v19 = vld [vmem:[#allocation10 + $0x1a0] sm:$0xff] }
 0x125   : > { %2997 = vmatpush1.bf16.msra.mxu1 %v3898_v20  ;;  %v1416_v20 = vld [vmem:[#allocation10 + $0x1e0] sm:$0xff] }
 0x126   : > { %1273 = vmatpush1.bf16.msra.mxu0 %v4222_v23  ;;  %v1540_v23 = vld [vmem:[#allocation10 + $0x5c0] sm:$0xff] }
 0x127   : > { %1274 = vmatprep.subr.bf16.mxu0 %v4227_v28  ;;  %v3915_v25 = vcombine.high %v1532_v22, %v1540_v23  ;;  %v3914_v26 = vcombine.low %v1532_v22, %v1540_v23  ;;  %v4260_v28 = vld [vmem:[#allocation9 + $0x2d4] ss:$8 sps:$4 sm:$0xff]   ;;  %v3795_v22 = vcombine.high %v1408_v19, %v1416_v20  ;;  %v1424_v23 = vld [vmem:[#allocation10 + $0x220] sm:$0xff] }
 0x128   : > { %v1584_v10 = vld [vmem:[#allocation10 + $0x720] sm:$0xff] }
 0x129   : > { %2998 = vmatprep.subr.bf16.mxu1 %v3915_v25  ;;  %v3794_v25 = vcombine.low %v1408_v19, %v1416_v20  ;;  %v1608_v20 = vld [vmem:[#allocation10 + $0x7e0] sm:$0xff] }
 0x12a   : > { %1275 = vmatpush1.bf16.msra.mxu0 %v4225_v31  ;;  %2999 = vmatpush1.bf16.msra.mxu1 %v3914_v26  ;;  %v4261_v31 = vld [vmem:[#allocation9 + $0x2e0] ss:$8 sps:$4 sm:$0xff]  }
 0x12b   : > { %1276 = vmatprep.subr.bf16.mxu0 %v4230_v34  ;;  %v396_v34 = vld [vmem:[#allocation12 + $0x20] sm:$0xff] }
 0x12e   : > { %1277 = vmatpush1.bf16.msra.mxu0 %v4228_v37  ;;  %v404_v37 = vpack.c.bf16 %v396_v34, %v396_v34 }
 0x12f   : > { %1278 = vmatprep.subr.bf16.mxu0 %v4233_v40  ;;  %v4272_v40 = vld [vmem:[#allocation9 + $0x314] ss:$8 sps:$4 sm:$0xff]  }
 0x132   : > { %1279 = vmatpush1.bf16.msra.mxu0 %v4231_v43  ;;  %v4273_v43 = vld [vmem:[#allocation9 + $0x320] ss:$8 sps:$4 sm:$0xff]  }
 0x133   : > { %1280 = vmatprep.subr.bf16.mxu0 %v4236_v46  ;;  %v4281_v46 = vld [vmem:[#allocation9 + $0x344] ss:$8 sps:$4 sm:$0xff]  }
 0x136   : > { %1281 = vmatpush1.bf16.msra.mxu0 %v4234_v49  ;;  %v4282_v49 = vld [vmem:[#allocation9 + $0x350] ss:$8 sps:$4 sm:$0xff]  }
 0x137   : > { %1282 = vmatprep.subr.bf16.mxu0 %v4239_v52  ;;  %v4290_v52 = vld [vmem:[#allocation9 + $0x374] ss:$8 sps:$4 sm:$0xff]  }
 0x13a   : > { %1283 = vmatpush1.bf16.msra.mxu0 %v4237_v55  ;;  %v4291_v55 = vld [vmem:[#allocation9 + $0x380] ss:$8 sps:$4 sm:$0xff]  }
 0x13b   : > { %1284 = vmatprep.subr.bf16.mxu0 %v4242_v58  ;;  %v4299_v58 = vld [vmem:[#allocation9 + $0x3a4] ss:$8 sps:$4 sm:$0xff]  }
 0x13e   : > { %1285 = vmatpush1.bf16.msra.mxu0 %v4240_v61  ;;  %v4300_v61 = vld [vmem:[#allocation9 + $0x3b0] ss:$8 sps:$4 sm:$0xff]  }
 0x13f   : > { %1286 = vmatprep.subr.bf16.mxu0 %v4245_v0  ;;  %v4308_v0 = vld [vmem:[#allocation9 + $0x3d4] ss:$8 sps:$4 sm:$0xff]  }
 0x142   : > { %1287 = vmatpush1.bf16.msra.mxu0 %v4243_v3  ;;  %v4309_v3 = vld [vmem:[#allocation9 + $0x3e0] ss:$8 sps:$4 sm:$0xff]  }
 0x143   : > { %1288 = vmatprep.subr.bf16.mxu0 %v4248_v6  ;;  %v1368_v6 = vld [vmem:[#allocation10 + $0x60] sm:$0xff] }
 0x144   : > { %v3746_v13 = vcombine.low %v1360_v5, %v1368_v6 }
 0x146   : > { %1289 = vmatpush1.bf16.msra.mxu0 %v4246_v9  ;;  %v3747_v9 = vcombine.high %v1360_v5, %v1368_v6 }
 0x147   : > { %1290 = vmatprep.subr.bf16.mxu0 %v4251_v12  ;;  %v406_v12 = vpack.c.bf16 %v398_v8, %v398_v8  ;;  %v1580_v8 = vld [vmem:[#allocation10 + $0x700] sm:$0xff] }
 0x14a   : > { %1291 = vmatpush1.bf16.msra.mxu0 %v4249_v15  ;;  %v1392_v15 = vld [vmem:[#allocation10 + $0x120] sm:$0xff] }
 0x14b   : > { %1292 = vmatprep.subr.bf16.mxu0 %v4254_v18  ;;  %v3779_v18 = vcombine.high %v1392_v15, %v1400_v16 }
 0x14e   : > { %1293 = vmatpush1.bf16.msra.mxu0 %v4252_v21  ;;  %v3778_v21 = vcombine.low %v1392_v15, %v1400_v16  ;;  %v1596_v16 = vld [vmem:[#allocation10 + $0x780] sm:$0xff] }
 0x14f   : > { %1294 = vmatprep.subr.bf16.mxu0 %v4257_v24  ;;  %v1432_v24 = vld [vmem:[#allocation10 + $0x260] sm:$0xff] }
 0x150   : > { %v3811_v26 = vcombine.high %v1424_v23, %v1432_v24 }
 0x152   : > { %1295 = vmatpush1.bf16.msra.mxu0 %v4255_v27  ;;  %v1440_v27 = vld [vmem:[#allocation10 + $0x2a0] sm:$0xff] }
 0x153   : > { %1296 = vmatprep.subr.bf16.mxu0 %v4260_v28  ;;  %v1448_v28 = vld [vmem:[#allocation10 + $0x2e0] sm:$0xff] }
 0x156   : > { %1297 = vmatpush1.bf16.msra.mxu0 %v4258_v29  ;;  %v3810_v29 = vcombine.low %v1424_v23, %v1432_v24  ;;  %v1357_v24 = vld [vmem:[#allocation10 + $0x8] sm:$0xff] }
 0x157   : > { %1298 = vmatprep.subr.bf16.mxu0 %v4263_v30  ;;  %v3827_v30 = vcombine.high %v1440_v27, %v1448_v28 }
 0x15a   : > { %1299 = vmatpush1.bf16.msra.mxu0 %v4261_v31  ;;  %v1456_v31 = vld [vmem:[#allocation10 + $0x320] sm:$0xff] }
 0x15b   : > { %1300 = vmatprep.subr.bf16.mxu0 %v4266_v32  ;;  %v1464_v32 = vld [vmem:[#allocation10 + $0x360] sm:$0xff] }
 0x15c   : > { %v3843_v34 = vcombine.high %v1456_v31, %v1464_v32 }
 0x15e   : > { %1301 = vmatpush1.bf16.msra.mxu0 %v4264_v33  ;;  %v3826_v33 = vcombine.low %v1440_v27, %v1448_v28  ;;  %v1370_v28 = vld [vmem:[#allocation10 + $0x70] sm:$0xff] }
 0x15f   : > { %1311 = vmatprep.subr.bf16.mxu0 %v4269_v35  ;;  %v1472_v35 = vld [vmem:[#allocation10 + $0x3a0] sm:$0xff] }
 0x161   : > { %1303 = vmatmul.mubr.bf16.vlgmr.msra.gmra.mrb[0].mxu0 %v404_v37  ;;  %v3842_v37 = vcombine.low %v1456_v31, %v1464_v32  ;;  %v538_v32 = vlaneseq }
 0x162   : > { %1312 = vmatpush1.bf16.msra.mxu0 %v4267_v38  ;;  %1343 = vmatprep.mubr.bf16.mxu0 %v407_v39  ;;  %v3859_v38 = vcombine.high %v1472_v35, %v1480_v36  ;;  %v1488_v39 = vld [vmem:[#allocation10 + $0x420] sm:$0xff] }
 0x163   : > { %1313 = vmatprep.subr.bf16.mxu0 %v4272_v40  ;;  %v1496_v40 = vld [vmem:[#allocation10 + $0x460] sm:$0xff] }
 0x166   : > { %1314 = vmatpush1.bf16.msra.mxu0 %v4270_v41  ;;  %v3858_v41 = vcombine.low %v1472_v35, %v1480_v36  ;;  %v536_v35 = vld [vmem:[%s4870_s16] sm:$0x3] }
 0x167   : > { %1315 = vmatprep.subr.bf16.mxu0 %v4275_v42  ;;  %v3875_v42 = vcombine.high %v1488_v39, %v1496_v40 }
 0x16a   : > { %1316 = vmatpush1.bf16.msra.mxu0 %v4273_v43  ;;  %v1504_v43 = vld [vmem:[#allocation10 + $0x4a0] sm:$0xff] }
 0x16b   : > { %1317 = vmatprep.subr.bf16.mxu0 %v4278_v44  ;;  %v1512_v44 = vld [vmem:[#allocation10 + $0x4e0] sm:$0xff] }
 0x16e   : > { %1318 = vmatpush1.bf16.msra.mxu0 %v4276_v45  ;;  %v3874_v45 = vcombine.low %v1488_v39, %v1496_v40 }
 0x16f   : > { %1319 = vmatprep.subr.bf16.mxu0 %v4281_v46  ;;  %v3891_v46 = vcombine.high %v1504_v43, %v1512_v44 }
 0x172   : > { %1320 = vmatpush1.bf16.msra.mxu0 %v4279_v47  ;;  %v1520_v47 = vld [vmem:[#allocation10 + $0x520] sm:$0xff] }
 0x173   : > { %1321 = vmatprep.subr.bf16.mxu0 %v4284_v48  ;;  %v1528_v48 = vld [vmem:[#allocation10 + $0x560] sm:$0xff] }
 0x176   : > { %1322 = vmatpush1.bf16.msra.mxu0 %v4282_v49  ;;  %v3890_v49 = vcombine.low %v1504_v43, %v1512_v44 }
 0x177   : > { %1323 = vmatprep.subr.bf16.mxu0 %v4287_v50  ;;  %v3907_v50 = vcombine.high %v1520_v47, %v1528_v48 }
 0x17a   : > { %1324 = vmatpush1.bf16.msra.mxu0 %v4285_v51  ;;  %v1536_v51 = vld [vmem:[#allocation10 + $0x5a0] sm:$0xff] }
 0x17b   : > { %1325 = vmatprep.subr.bf16.mxu0 %v4290_v52  ;;  %v1544_v52 = vld [vmem:[#allocation10 + $0x5e0] sm:$0xff] }
 0x17e   : > { %1326 = vmatpush1.bf16.msra.mxu0 %v4288_v53  ;;  %v3906_v53 = vcombine.low %v1520_v47, %v1528_v48  ;;  %v1381_v48 = vld [vmem:[#allocation10 + $0xc8] sm:$0xff] }
 0x17f   : > { %1327 = vmatprep.subr.bf16.mxu0 %v4293_v54  ;;  %v3923_v54 = vcombine.high %v1536_v51, %v1544_v52 }
 0x182   : > { %1328 = vmatpush1.bf16.msra.mxu0 %v4291_v55  ;;  %v3922_v55 = vcombine.low %v1536_v51, %v1544_v52 }
 0x183   : > { %1329 = vmatprep.subr.bf16.mxu0 %v4296_v56  ;;  %v1548_v56 = vld [vmem:[#allocation10 + $0x600] sm:$0xff] }
 0x186   : > { %1330 = vmatpush1.bf16.msra.mxu0 %v4294_v57  ;;  %v1556_v57 = vld [vmem:[#allocation10 + $0x640] sm:$0xff] }
 0x187   : > { %1331 = vmatprep.subr.bf16.mxu0 %v4299_v58  ;;  %v1552_v58 = vld [vmem:[#allocation10 + $0x620] sm:$0xff] }
 0x18a   : > { %1332 = vmatpush1.bf16.msra.mxu0 %v4297_v59  ;;  %v3931_v59 = vcombine.high %v1548_v56, %v1556_v57 }
 0x18b   : > { %1333 = vmatprep.subr.bf16.mxu0 %v4302_v60  ;;  %v1560_v60 = vld [vmem:[#allocation10 + $0x660] sm:$0xff] }
 0x18c   : > { %3000 = vmatprep.subr.bf16.mxu1 %v3931_v59 }
 0x18e   : > { %1334 = vmatpush1.bf16.msra.mxu0 %v4300_v61  ;;  %v3938_v61 = vcombine.low %v1552_v58, %v1560_v60 }
 0x18f   : > { %1335 = vmatprep.subr.bf16.mxu0 %v4305_v62  ;;  %v3939_v62 = vcombine.high %v1552_v58, %v1560_v60  ;;  %v1402_v58 = vld [vmem:[#allocation10 + $0x170] sm:$0xff] }
 0x192   : > { %1336 = vmatpush1.bf16.msra.mxu0 %v4303_v63  ;;  %v3930_v63 = vcombine.low %v1548_v56, %v1556_v57  ;;  %v1397_v56 = vld [vmem:[#allocation10 + $0x148] sm:$0xff]  ;;  %v1394_v57 = vld [vmem:[#allocation10 + $0x130] sm:$0xff] }
 0x193   : > { %1337 = vmatprep.subr.bf16.mxu0 %v4308_v0  ;;  %v1564_v0 = vld [vmem:[#allocation10 + $0x680] sm:$0xff] }
 0x194   : > { %3001 = vmatpush1.bf16.msra.mxu1 %v3930_v63  ;;  %v1405_v63 = vld [vmem:[#allocation10 + $0x188] sm:$0xff] }
 0x196   : > { %1338 = vmatpush1.bf16.msra.mxu0 %v4306_v1  ;;  %v1572_v1 = vld [vmem:[#allocation10 + $0x6c0] sm:$0xff] }
 0x197   : > { %1339 = vmatprep.subr.bf16.mxu0 %v4311_v2  ;;  %v1568_v2 = vld [vmem:[#allocation10 + $0x6a0] sm:$0xff] }
 0x19a   : > { %1340 = vmatpush1.bf16.msra.mxu0 %v4309_v3  ;;  %v3947_v3 = vcombine.high %v1564_v0, %v1572_v1 }
 0x19b   : > { %1341 = vmatprep.subr.bf16.mxu0 %v4314_v4  ;;  %v1576_v4 = vld [vmem:[#allocation10 + $0x6e0] sm:$0xff] }
 0x19c   : > { %v3954_v5 = vcombine.low %v1568_v2, %v1576_v4  ;;  %v3955_v6 = vcombine.high %v1568_v2, %v1576_v4  ;;  %3002 = vmatprep.subr.bf16.mxu1 %v3947_v3  ;;  %v1418_v2 = vld [vmem:[#allocation10 + $0x1f0] sm:$0xff]  ;;  %v3782_v4 = vcombine.low %v1394_v57, %v1402_v58 }
 0x19e   : > { %1342 = vmatpush1.bf16.msra.mxu0 %v4312_v7  ;;  %v3946_v7 = vcombine.low %v1564_v0, %v1572_v1  ;;  %v1413_v0 = vld [vmem:[#allocation10 + $0x1c8] sm:$0xff]  ;;  %v1410_v1 = vld [vmem:[#allocation10 + $0x1b0] sm:$0xff] }
 0x19f   : > { %3140 = vmatprep.subr.bf16.mxu0 %v3747_v9  ;;  %v1588_v9 = vld [vmem:[#allocation10 + $0x740] sm:$0xff] }
 0x1a0   : > { %3003 = vmatpush1.bf16.msra.mxu1 %v3946_v7  ;;  %v3963_v11 = vcombine.high %v1580_v8, %v1588_v9  ;;  %v3962_v15 = vcombine.low %v1580_v8, %v1588_v9  ;;  %v1421_v7 = vld [vmem:[#allocation10 + $0x208] sm:$0xff]  ;;  %v1426_v9 = vld [vmem:[#allocation10 + $0x230] sm:$0xff] }
 0x1a1   : > { %1344 = vmatmul.mubr.bf16.vlgmr.msra.gmra.mrb[0].mxu0 %v406_v12  ;;  %v1592_v12 = vld [vmem:[#allocation10 + $0x760] sm:$0xff]  ;;  %v1429_v8 = vld [vmem:[#allocation10 + $0x248] sm:$0xff] }
 0x1a2   : > { %3141 = vmatpush1.bf16.msra.mxu0 %v3746_v13  ;;  %v3970_v13 = vcombine.low %v1584_v10, %v1592_v12  ;;  %3004 = vmatprep.subr.bf16.mxu1 %v3963_v11  ;;  %v3788_v11 = vcombine.low %v1405_v63, %v1413_v0 }
 0x1a3   : > { %3142 = vmatprep.subr.bf16.mxu0 %v3763_v14  ;;  %v3971_v14 = vcombine.high %v1584_v10, %v1592_v12  ;;  %v1434_v10 = vld [vmem:[#allocation10 + $0x270] sm:$0xff]  ;;  %v3798_v12 = vcombine.low %v1410_v1, %v1418_v2 }
 0x1a4   : > { %3005 = vmatpush1.bf16.msra.mxu1 %v3962_v15  ;;  %v1437_v15 = vld [vmem:[#allocation10 + $0x288] sm:$0xff] }
 0x1a6   : > { %3143 = vmatpush1.bf16.msra.mxu0 %v3762_v17  ;;  %v1604_v17 = vld [vmem:[#allocation10 + $0x7c0] sm:$0xff] }
 0x1a7   : > { %3144 = vmatprep.subr.bf16.mxu0 %v3779_v18  ;;  %v1600_v18 = vld [vmem:[#allocation10 + $0x7a0] sm:$0xff]  ;;  %v3979_v19 = vcombine.high %v1596_v16, %v1604_v17  ;;  %v3978_v23 = vcombine.low %v1596_v16, %v1604_v17  ;;  %v1445_v16 = vld [vmem:[#allocation10 + $0x2c8] sm:$0xff]  ;;  %v1442_v17 = vld [vmem:[#allocation10 + $0x2b0] sm:$0xff] }
 0x1a9   : > { %3006 = vmatprep.subr.bf16.mxu1 %v3979_v19  ;;  %v3804_v19 = vcombine.low %v1421_v7, %v1429_v8 }
 0x1aa   : > { %3145 = vmatpush1.bf16.msra.mxu0 %v3778_v21  ;;  %v3986_v21 = vcombine.low %v1600_v18, %v1608_v20  ;;  %3007 = vmatpush1.bf16.msra.mxu1 %v3978_v23  ;;  %v1453_v23 = vld [vmem:[#allocation10 + $0x308] sm:$0xff] }
 0x1ab   : > { %3146 = vmatprep.subr.bf16.mxu0 %v3795_v22  ;;  %v3987_v22 = vcombine.high %v1600_v18, %v1608_v20  ;;  %v1450_v18 = vld [vmem:[#allocation10 + $0x2f0] sm:$0xff]  ;;  %v3814_v20 = vcombine.low %v1426_v9, %v1434_v10 }
 0x1ae   : > { %3147 = vmatpush1.bf16.msra.mxu0 %v3794_v25  ;;  %v1365_v25 = vld [vmem:[#allocation10 + $0x48] sm:$0xff] }
 0x1af   : > { %3148 = vmatprep.subr.bf16.mxu0 %v3811_v26  ;;  %v1362_v26 = vld [vmem:[#allocation10 + $0x30] sm:$0xff]  ;;  %v3741_v27 = vcombine.high %v1357_v24, %v1365_v25 }
 0x1b0   : > { %v3751_v31 = vcombine.high %v1362_v26, %v1370_v28 }
 0x1b1   : > { %3017 = vmatprep.subr.bf16.mxu1 %v3741_v27  ;;  %v3820_v27 = vcombine.low %v1437_v15, %v1445_v16 }
 0x1b2   : > { %3149 = vmatpush1.bf16.msra.mxu0 %v3810_v29  ;;  %v3740_v29 = vcombine.low %v1357_v24, %v1365_v25  ;;  %v1461_v24 = vld [vmem:[#allocation10 + $0x348] sm:$0xff]  ;;  %v1458_v25 = vld [vmem:[#allocation10 + $0x330] sm:$0xff] }
 0x1b3   : > { %3150 = vmatprep.subr.bf16.mxu0 %v3827_v30  ;;  %v3750_v30 = vcombine.low %v1362_v26, %v1370_v28  ;;  %v1466_v26 = vld [vmem:[#allocation10 + $0x370] sm:$0xff]  ;;  %v3830_v28 = vcombine.low %v1442_v17, %v1450_v18 }
 0x1b6   : > { %3151 = vmatpush1.bf16.msra.mxu0 %v3826_v33  ;;  %v4874_v33 = vshrl.u32 %v538_v32, 7  ;;  %v1477_v32 = vld [vmem:[#allocation10 + $0x3c8] sm:$0xff] }
 0x1b7   : > { %3152 = vmatprep.subr.bf16.mxu0 %v3843_v34 }
 0x1b8   : > { %v4877_v34 = vsub.s32 0, %v4874_v33  ;;  %v4881_v36 = vsub.s32 1, %v4874_v33 }
 0x1ba   : > { %3153 = vmatpush1.bf16.msra.mxu0 %v3842_v37  ;;  %v541_v37 = vrot.slane %v536_v35, %v4877_v34 }
 0x1bb   : > { %3154 = vmatprep.subr.bf16.mxu0 %v3859_v38  ;;  %v545_v38 = vrot.slane %v536_v35, %v4881_v36  ;;  %v1474_v35 = vld [vmem:[#allocation10 + $0x3b0] sm:$0xff] }
 0x1be   : > { %3155 = vmatpush1.bf16.msra.mxu0 %v3858_v41 }
 0x1bf   : > { %3156 = vmatprep.subr.bf16.mxu0 %v3875_v42 }
 0x1c2   : > { %3157 = vmatpush1.bf16.msra.mxu0 %v3874_v45 }
 0x1c3   : > { %3158 = vmatprep.subr.bf16.mxu0 %v3891_v46  ;;  %v1373_v46 = vld [vmem:[#allocation10 + $0x88] sm:$0xff] }
 0x1c4   : > { %v3756_v59 = vcombine.low %v1373_v46, %v1381_v48 }
 0x1c6   : > { %3159 = vmatpush1.bf16.msra.mxu0 %v3890_v49  ;;  %v1378_v49 = vld [vmem:[#allocation10 + $0xb0] sm:$0xff] }
 0x1c7   : > { %3160 = vmatprep.subr.bf16.mxu0 %v3907_v50  ;;  %v1386_v50 = vld [vmem:[#allocation10 + $0xf0] sm:$0xff] }
 0x1c8   : > { %v3766_v60 = vcombine.low %v1378_v49, %v1386_v50 }
 0x1ca   : > { %3161 = vmatpush1.bf16.msra.mxu0 %v3906_v53  ;;  %v1389_v53 = vld [vmem:[#allocation10 + $0x108] sm:$0xff] }
 0x1cb   : > { %3162 = vmatprep.subr.bf16.mxu0 %v3923_v54  ;;  %v3757_v54 = vcombine.high %v1373_v46, %v1381_v48  ;;  %v3772_v3 = vcombine.low %v1389_v53, %v1397_v56 }
 0x1ce   : > { %3163 = vmatpush1.bf16.msra.mxu0 %v3922_v55  ;;  %v3767_v55 = vcombine.high %v1378_v49, %v1386_v50  ;;  %v1501_v50 = vld [vmem:[#allocation10 + $0x488] sm:$0xff] }
 0x1cf   : > { %3164 = vmatprep.subr.bf16.mxu0 %v3939_v62  ;;  %v3783_v62 = vcombine.high %v1394_v57, %v1402_v58 }
 0x1d2   : > { %3165 = vmatpush1.bf16.msra.mxu0 %v3938_v61  ;;  %v3773_v61 = vcombine.high %v1389_v53, %v1397_v56  ;;  %v1509_v53 = vld [vmem:[#allocation10 + $0x4c8] sm:$0xff] }
 0x1d3   : > { %3166 = vmatprep.subr.bf16.mxu0 %v3955_v6  ;;  %v3799_v6 = vcombine.high %v1410_v1, %v1418_v2  ;;  %v3885_v58 = vcombine.high %v1501_v50, %v1509_v53 }
 0x1d6   : > { %3167 = vmatpush1.bf16.msra.mxu0 %v3954_v5  ;;  %v3789_v5 = vcombine.high %v1405_v63, %v1413_v0  ;;  %v1530_v63 = vld [vmem:[#allocation10 + $0x570] sm:$0xff]  ;;  %v3884_v0 = vcombine.low %v1501_v50, %v1509_v53 }
 0x1d7   : > { %3168 = vmatprep.subr.bf16.mxu0 %v3971_v14  ;;  %v3815_v14 = vcombine.high %v1426_v9, %v1434_v10 }
 0x1da   : > { %3169 = vmatpush1.bf16.msra.mxu0 %v3970_v13  ;;  %v3805_v13 = vcombine.high %v1421_v7, %v1429_v8  ;;  %v1546_v7 = vld [vmem:[#allocation10 + $0x5f0] sm:$0xff] }
 0x1db   : > { %3170 = vmatprep.subr.bf16.mxu0 %v3987_v22  ;;  %v3831_v22 = vcombine.high %v1442_v17, %v1450_v18 }
 0x1de   : > { %3171 = vmatpush1.bf16.msra.mxu0 %v3986_v21  ;;  %v3821_v21 = vcombine.high %v1437_v15, %v1445_v16  ;;  %v1562_v15 = vld [vmem:[#allocation10 + $0x670] sm:$0xff] }
 0x1df   : > { %3222 = vmatprep.subr.bf16.mxu0 %v3751_v31  ;;  %v1469_v31 = vld [vmem:[#allocation10 + $0x388] sm:$0xff] }
 0x1e0   : > { %v3852_v46 = vcombine.low %v1469_v31, %v1477_v32 }
 0x274   : > { %v1345_v39 = vpop.f32.mrb[0].mxu0 }
 0x275   : > { %v4013_v40 = vadd.f32 %v1345_v39, %v541_v37  ;;  %v1347_v41 = vpop.f32.mrb[1].mxu0  ;;  %v1482_v37 = vld [vmem:[#allocation10 + $0x3f0] sm:$0xff]  ;;  %v3846_v39 = vcombine.low %v1458_v25, %v1466_v26 }
 0x276   : > { %v4014_v42 = vadd.f32 %v1347_v41, %v545_v38  ;;  %v1349_v43 = vpop.f32.mrb[2].mxu0  ;;  %v3836_v38 = vcombine.low %v1453_v23, %v1461_v24  ;;  %v3863_v41 = vcombine.high %v1474_v35, %v1482_v37 }
 0x277   : > { %4315 = vtanh.f32 %v4013_v40  ;;  %v1350_v44 = vpop.f32.mrb[3].mxu0  ;;  %v3853_v40 = vcombine.high %v1469_v31, %v1477_v32  ;;  %v1493_v43 = vld [vmem:[#allocation10 + $0x448] sm:$0xff]  ;;  %v1594_v31 = vld [vmem:[#allocation10 + $0x770] sm:$0xff] }
 0x278   : > { %4317 = vtanh.f32 %v4014_v42  ;;  %v1485_v42 = vld [vmem:[#allocation10 + $0x408] sm:$0xff]  ;;  %v1490_v44 = vld [vmem:[#allocation10 + $0x430] sm:$0xff] }
 0x279   : > { %v3869_v48 = vcombine.high %v1485_v42, %v1493_v43  ;;  %v3868_v56 = vcombine.low %v1485_v42, %v1493_v43  ;;  %v1610_v42 = vld [vmem:[#allocation10 + $0x7f0] sm:$0xff] }
 0x281   : > { %v4316_v45 = vpop.eup %4315 }
 0x282   : > { %v4318_v47 = vpop.eup %4317  ;;  %v4887_v52 = vpack.c.bf16 %v4316_v45, %v4316_v45  ;;  %v1498_v45 = vld [vmem:[#allocation10 + $0x470] sm:$0xff] }
 0x283   : > { %v4885_v51 = vpack.c.bf16 %v4318_v47, %v4318_v47  ;;  %v3862_v47 = vcombine.low %v1474_v35, %v1482_v37  ;;  %v3879_v49 = vcombine.high %v1490_v44, %v1498_v45  ;;  %v3878_v57 = vcombine.low %v1490_v44, %v1498_v45 }
 0x285   : > { %3008 = vmatprep.mubr.bf16.mxu1 %v4885_v51  ;;  %3172 = vmatprep.mubr.bf16.mxu0 %v4885_v51 }
 0x286   : > { %3009 = vmatmul.mubr.bf16.vlgmr.msra.gmra.mrb[0].mxu1 %v4887_v52  ;;  %3173 = vmatmul.mubr.bf16.vlgmr.msra.gmra.mrb[4].mxu0 %v4887_v52 }
 0x287   : > { %3018 = vmatpush1.bf16.msra.mxu1 %v3740_v29  ;;  %3223 = vmatpush1.bf16.msra.mxu0 %v3750_v30  ;;  %v3837_v29 = vcombine.high %v1453_v23, %v1461_v24  ;;  %v3847_v30 = vcombine.high %v1458_v25, %v1466_v26  ;;  %v1578_v23 = vld [vmem:[#allocation10 + $0x6f0] sm:$0xff] }
 0x288   : > { %3049 = vmatprep.mubr.bf16.mxu1 %v4885_v51  ;;  %3254 = vmatprep.mubr.bf16.mxu0 %v4885_v51 }
 0x289   : > { %3019 = vmatprep.subr.bf16.mxu1 %v3757_v54  ;;  %3224 = vmatprep.subr.bf16.mxu0 %v3767_v55  ;;  %v1506_v54 = vld [vmem:[#allocation10 + $0x4b0] sm:$0xff] }
 0x28a   : > { %v1514_v55 = vld [vmem:[#allocation10 + $0x4f0] sm:$0xff] }
 0x28b   : > { %3020 = vmatpush1.bf16.msra.mxu1 %v3756_v59  ;;  %3225 = vmatpush1.bf16.msra.mxu0 %v3766_v60  ;;  %v3895_v59 = vcombine.high %v1506_v54, %v1514_v55  ;;  %v1517_v60 = vld [vmem:[#allocation10 + $0x508] sm:$0xff]  ;;  %v3894_v1 = vcombine.low %v1506_v54, %v1514_v55  ;;  %v1374_v54 = vld [vmem:[#allocation10 + $0x90] sm:$0xff] }
 0x28c   : > { %3021 = vmatprep.subr.bf16.mxu1 %v3773_v61  ;;  %3226 = vmatprep.subr.bf16.mxu0 %v3783_v62  ;;  %v1525_v61 = vld [vmem:[#allocation10 + $0x548] sm:$0xff]  ;;  %v1522_v62 = vld [vmem:[#allocation10 + $0x530] sm:$0xff] }
 0x28d   : > { %v3901_v2 = vcombine.high %v1517_v60, %v1525_v61  ;;  %v3900_v8 = vcombine.low %v1517_v60, %v1525_v61  ;;  %v3910_v9 = vcombine.low %v1522_v62, %v1530_v63  ;;  %v1382_v55 = vld [vmem:[#allocation10 + $0xd0] sm:$0xff] }
 0x28e   : > { %v3758_v60 = vcombine.low %v1374_v54, %v1382_v55 }
 0x28f   : > { %3022 = vmatpush1.bf16.msra.mxu1 %v3772_v3  ;;  %3227 = vmatpush1.bf16.msra.mxu0 %v3782_v4  ;;  %v3911_v3 = vcombine.high %v1522_v62, %v1530_v63  ;;  %v1533_v4 = vld [vmem:[#allocation10 + $0x588] sm:$0xff]  ;;  %v1406_v62 = vld [vmem:[#allocation10 + $0x190] sm:$0xff] }
 0x290   : > { %3023 = vmatprep.subr.bf16.mxu1 %v3789_v5  ;;  %3228 = vmatprep.subr.bf16.mxu0 %v3799_v6  ;;  %v1541_v5 = vld [vmem:[#allocation10 + $0x5c8] sm:$0xff]  ;;  %v1538_v6 = vld [vmem:[#allocation10 + $0x5b0] sm:$0xff] }
 0x291   : > { %v3917_v10 = vcombine.high %v1533_v4, %v1541_v5  ;;  %v3916_v16 = vcombine.low %v1533_v4, %v1541_v5  ;;  %v3926_v17 = vcombine.low %v1538_v6, %v1546_v7  ;;  %v1414_v63 = vld [vmem:[#allocation10 + $0x1d0] sm:$0xff] }
 0x292   : > { %v3790_v4 = vcombine.low %v1406_v62, %v1414_v63 }
 0x293   : > { %3024 = vmatpush1.bf16.msra.mxu1 %v3788_v11  ;;  %3229 = vmatpush1.bf16.msra.mxu0 %v3798_v12  ;;  %v3927_v11 = vcombine.high %v1538_v6, %v1546_v7  ;;  %v1549_v12 = vld [vmem:[#allocation10 + $0x608] sm:$0xff]  ;;  %v1438_v6 = vld [vmem:[#allocation10 + $0x290] sm:$0xff] }
 0x294   : > { %3025 = vmatprep.subr.bf16.mxu1 %v3805_v13  ;;  %3230 = vmatprep.subr.bf16.mxu0 %v3815_v14  ;;  %v1557_v13 = vld [vmem:[#allocation10 + $0x648] sm:$0xff]  ;;  %v1554_v14 = vld [vmem:[#allocation10 + $0x630] sm:$0xff] }
 0x295   : > { %v3933_v18 = vcombine.high %v1549_v12, %v1557_v13  ;;  %v3932_v24 = vcombine.low %v1549_v12, %v1557_v13  ;;  %v3942_v25 = vcombine.low %v1554_v14, %v1562_v15  ;;  %v1446_v7 = vld [vmem:[#allocation10 + $0x2d0] sm:$0xff] }
 0x296   : > { %v3822_v12 = vcombine.low %v1438_v6, %v1446_v7 }
 0x297   : > { %3026 = vmatpush1.bf16.msra.mxu1 %v3804_v19  ;;  %3231 = vmatpush1.bf16.msra.mxu0 %v3814_v20  ;;  %v3943_v19 = vcombine.high %v1554_v14, %v1562_v15  ;;  %v1565_v20 = vld [vmem:[#allocation10 + $0x688] sm:$0xff]  ;;  %v1470_v14 = vld [vmem:[#allocation10 + $0x390] sm:$0xff] }
 0x298   : > { %3027 = vmatprep.subr.bf16.mxu1 %v3821_v21  ;;  %3232 = vmatprep.subr.bf16.mxu0 %v3831_v22  ;;  %v1573_v21 = vld [vmem:[#allocation10 + $0x6c8] sm:$0xff]  ;;  %v1570_v22 = vld [vmem:[#allocation10 + $0x6b0] sm:$0xff] }
 0x299   : > { %v3949_v26 = vcombine.high %v1565_v20, %v1573_v21  ;;  %v3948_v32 = vcombine.low %v1565_v20, %v1573_v21  ;;  %v3958_v35 = vcombine.low %v1570_v22, %v1578_v23  ;;  %v1478_v15 = vld [vmem:[#allocation10 + $0x3d0] sm:$0xff] }
 0x29a   : > { %v3854_v20 = vcombine.low %v1470_v14, %v1478_v15 }
 0x29b   : > { %3028 = vmatpush1.bf16.msra.mxu1 %v3820_v27  ;;  %3233 = vmatpush1.bf16.msra.mxu0 %v3830_v28  ;;  %v3959_v27 = vcombine.high %v1570_v22, %v1578_v23  ;;  %v1581_v28 = vld [vmem:[#allocation10 + $0x708] sm:$0xff]  ;;  %v1502_v22 = vld [vmem:[#allocation10 + $0x490] sm:$0xff] }
 0x29c   : > { %3029 = vmatprep.subr.bf16.mxu1 %v3837_v29  ;;  %3234 = vmatprep.subr.bf16.mxu0 %v3847_v30  ;;  %v1589_v29 = vld [vmem:[#allocation10 + $0x748] sm:$0xff]  ;;  %v1586_v30 = vld [vmem:[#allocation10 + $0x730] sm:$0xff] }
 0x29d   : > { %v3965_v37 = vcombine.high %v1581_v28, %v1589_v29  ;;  %v3964_v43 = vcombine.low %v1581_v28, %v1589_v29  ;;  %v3974_v44 = vcombine.low %v1586_v30, %v1594_v31  ;;  %v1510_v23 = vld [vmem:[#allocation10 + $0x4d0] sm:$0xff] }
 0x29e   : > { %v3886_v28 = vcombine.low %v1502_v22, %v1510_v23 }
 0x29f   : > { %3030 = vmatpush1.bf16.msra.mxu1 %v3836_v38  ;;  %3235 = vmatpush1.bf16.msra.mxu0 %v3846_v39  ;;  %v3975_v38 = vcombine.high %v1586_v30, %v1594_v31  ;;  %v1597_v39 = vld [vmem:[#allocation10 + $0x788] sm:$0xff]  ;;  %v1534_v30 = vld [vmem:[#allocation10 + $0x590] sm:$0xff] }
 0x2a0   : > { %3031 = vmatprep.subr.bf16.mxu1 %v3853_v40  ;;  %3236 = vmatprep.subr.bf16.mxu0 %v3863_v41  ;;  %v1605_v40 = vld [vmem:[#allocation10 + $0x7c8] sm:$0xff]  ;;  %v1602_v41 = vld [vmem:[#allocation10 + $0x7b0] sm:$0xff] }
 0x2a1   : > { %v3981_v45 = vcombine.high %v1597_v39, %v1605_v40  ;;  %v3990_v50 = vcombine.low %v1602_v41, %v1610_v42  ;;  %v1542_v31 = vld [vmem:[#allocation10 + $0x5d0] sm:$0xff] }
 0x2a3   : > { %3032 = vmatpush1.bf16.msra.mxu1 %v3852_v46  ;;  %3237 = vmatpush1.bf16.msra.mxu0 %v3862_v47  ;;  %v3991_v46 = vcombine.high %v1602_v41, %v1610_v42  ;;  %v1358_v47 = vld [vmem:[#allocation10 + $0x10] sm:$0xff] }
 0x2a4   : > { %3033 = vmatprep.subr.bf16.mxu1 %v3869_v48  ;;  %3238 = vmatprep.subr.bf16.mxu0 %v3879_v49  ;;  %v1366_v48 = vld [vmem:[#allocation10 + $0x50] sm:$0xff]  ;;  %v3980_v49 = vcombine.low %v1597_v39, %v1605_v40  ;;  %v3918_v39 = vcombine.low %v1534_v30, %v1542_v31 }
 0x2a5   : > { %v3743_v53 = vcombine.high %v1358_v47, %v1366_v48  ;;  %v1566_v41 = vld [vmem:[#allocation10 + $0x690] sm:$0xff] }
 0x2a6   : > { %v1574_v42 = vld [vmem:[#allocation10 + $0x6d0] sm:$0xff] }
 0x2a7   : > { %3034 = vmatpush1.bf16.msra.mxu1 %v3868_v56  ;;  %3239 = vmatpush1.bf16.msra.mxu0 %v3878_v57  ;;  %v3742_v56 = vcombine.low %v1358_v47, %v1366_v48  ;;  %v3759_v57 = vcombine.high %v1374_v54, %v1382_v55  ;;  %v3950_v47 = vcombine.low %v1566_v41, %v1574_v42  ;;  %v1359_v55 = vld [vmem:[#allocation10 + $0x18] sm:$0xff] }
 0x2a8   : > { %3035 = vmatprep.subr.bf16.mxu1 %v3885_v58  ;;  %3240 = vmatprep.subr.bf16.mxu0 %v3895_v59  ;;  %v1390_v58 = vld [vmem:[#allocation10 + $0x110] sm:$0xff] }
 0x2a9   : > { %v1398_v59 = vld [vmem:[#allocation10 + $0x150] sm:$0xff] }
 0x2aa   : > { %v3775_v61 = vcombine.high %v1390_v58, %v1398_v59 }
 0x2ab   : > { %3036 = vmatpush1.bf16.msra.mxu1 %v3884_v0  ;;  %3241 = vmatpush1.bf16.msra.mxu0 %v3894_v1  ;;  %v3774_v0 = vcombine.low %v1390_v58, %v1398_v59  ;;  %v3791_v1 = vcombine.high %v1406_v62, %v1414_v63  ;;  %v1375_v59 = vld [vmem:[#allocation10 + $0x98] sm:$0xff] }
 0x2ac   : > { %3037 = vmatprep.subr.bf16.mxu1 %v3901_v2  ;;  %3242 = vmatprep.subr.bf16.mxu0 %v3911_v3  ;;  %v1422_v2 = vld [vmem:[#allocation10 + $0x210] sm:$0xff]  ;;  %v1391_v63 = vld [vmem:[#allocation10 + $0x118] sm:$0xff] }
 0x2ad   : > { %v1430_v3 = vld [vmem:[#allocation10 + $0x250] sm:$0xff] }
 0x2ae   : > { %v3807_v5 = vcombine.high %v1422_v2, %v1430_v3 }
 0x2af   : > { %3038 = vmatpush1.bf16.msra.mxu1 %v3900_v8  ;;  %3243 = vmatpush1.bf16.msra.mxu0 %v3910_v9  ;;  %v3806_v8 = vcombine.low %v1422_v2, %v1430_v3  ;;  %v3823_v9 = vcombine.high %v1438_v6, %v1446_v7  ;;  %v1407_v3 = vld [vmem:[#allocation10 + $0x198] sm:$0xff] }
 0x2b0   : > { %3039 = vmatprep.subr.bf16.mxu1 %v3917_v10  ;;  %3244 = vmatprep.subr.bf16.mxu0 %v3927_v11  ;;  %v1454_v10 = vld [vmem:[#allocation10 + $0x310] sm:$0xff]  ;;  %v1423_v7 = vld [vmem:[#allocation10 + $0x218] sm:$0xff] }
 0x2b1   : > { %v1462_v11 = vld [vmem:[#allocation10 + $0x350] sm:$0xff] }
 0x2b2   : > { %v3839_v13 = vcombine.high %v1454_v10, %v1462_v11 }
 0x2b3   : > { %3040 = vmatpush1.bf16.msra.mxu1 %v3916_v16  ;;  %3245 = vmatpush1.bf16.msra.mxu0 %v3926_v17  ;;  %v3838_v16 = vcombine.low %v1454_v10, %v1462_v11  ;;  %v3855_v17 = vcombine.high %v1470_v14, %v1478_v15  ;;  %v1439_v11 = vld [vmem:[#allocation10 + $0x298] sm:$0xff] }
 0x2b4   : > { %3041 = vmatprep.subr.bf16.mxu1 %v3933_v18  ;;  %3246 = vmatprep.subr.bf16.mxu0 %v3943_v19  ;;  %v1486_v18 = vld [vmem:[#allocation10 + $0x410] sm:$0xff]  ;;  %v1455_v15 = vld [vmem:[#allocation10 + $0x318] sm:$0xff] }
 0x2b5   : > { %v1494_v19 = vld [vmem:[#allocation10 + $0x450] sm:$0xff] }
 0x2b6   : > { %v3871_v21 = vcombine.high %v1486_v18, %v1494_v19 }
 0x2b7   : > { %3042 = vmatpush1.bf16.msra.mxu1 %v3932_v24  ;;  %3247 = vmatpush1.bf16.msra.mxu0 %v3942_v25  ;;  %v3870_v24 = vcombine.low %v1486_v18, %v1494_v19  ;;  %v3887_v25 = vcombine.high %v1502_v22, %v1510_v23  ;;  %v1471_v19 = vld [vmem:[#allocation10 + $0x398] sm:$0xff] }
 0x2b8   : > { %3043 = vmatprep.subr.bf16.mxu1 %v3949_v26  ;;  %3248 = vmatprep.subr.bf16.mxu0 %v3959_v27  ;;  %v1518_v26 = vld [vmem:[#allocation10 + $0x510] sm:$0xff]  ;;  %v1487_v23 = vld [vmem:[#allocation10 + $0x418] sm:$0xff] }
 0x2b9   : > { %v1526_v27 = vld [vmem:[#allocation10 + $0x550] sm:$0xff] }
 0x2ba   : > { %v3903_v29 = vcombine.high %v1518_v26, %v1526_v27 }
 0x2bb   : > { %3044 = vmatpush1.bf16.msra.mxu1 %v3948_v32  ;;  %3249 = vmatpush1.bf16.msra.mxu0 %v3958_v35  ;;  %v3902_v32 = vcombine.low %v1518_v26, %v1526_v27  ;;  %v3919_v35 = vcombine.high %v1534_v30, %v1542_v31  ;;  %v1503_v27 = vld [vmem:[#allocation10 + $0x498] sm:$0xff] }
 0x2bc   : > { %3045 = vmatprep.subr.bf16.mxu1 %v3965_v37  ;;  %3250 = vmatprep.subr.bf16.mxu0 %v3975_v38  ;;  %v1550_v37 = vld [vmem:[#allocation10 + $0x610] sm:$0xff]  ;;  %v1519_v31 = vld [vmem:[#allocation10 + $0x518] sm:$0xff] }
 0x2bd   : > { %v1558_v38 = vld [vmem:[#allocation10 + $0x650] sm:$0xff] }
 0x2be   : > { %v3935_v40 = vcombine.high %v1550_v37, %v1558_v38 }
 0x2bf   : > { %3046 = vmatpush1.bf16.msra.mxu1 %v3964_v43  ;;  %3251 = vmatpush1.bf16.msra.mxu0 %v3974_v44  ;;  %v3934_v43 = vcombine.low %v1550_v37, %v1558_v38  ;;  %v3951_v44 = vcombine.high %v1566_v41, %v1574_v42  ;;  %v1535_v38 = vld [vmem:[#allocation10 + $0x598] sm:$0xff] }
 0x2c0   : > { %3047 = vmatprep.subr.bf16.mxu1 %v3981_v45  ;;  %3252 = vmatprep.subr.bf16.mxu0 %v3991_v46  ;;  %v1582_v45 = vld [vmem:[#allocation10 + $0x710] sm:$0xff]  ;;  %v1551_v42 = vld [vmem:[#allocation10 + $0x618] sm:$0xff] }
 0x2c1   : > { %v1590_v46 = vld [vmem:[#allocation10 + $0x750] sm:$0xff] }
 0x2c2   : > { %v3967_v48 = vcombine.high %v1582_v45, %v1590_v46 }
 0x2c3   : > { %3048 = vmatpush1.bf16.msra.mxu1 %v3980_v49  ;;  %3253 = vmatpush1.bf16.msra.mxu0 %v3990_v50  ;;  %v1598_v49 = vld [vmem:[#allocation10 + $0x790] sm:$0xff] }
 0x2c4   : > { %3058 = vmatprep.subr.bf16.mxu1 %v3743_v53  ;;  %v1606_v50 = vld [vmem:[#allocation10 + $0x7d0] sm:$0xff]  ;;  %v3966_v53 = vcombine.low %v1582_v45, %v1590_v46  ;;  %v1567_v46 = vld [vmem:[#allocation10 + $0x698] sm:$0xff] }
 0x2c5   : > { %v3983_v54 = vcombine.high %v1598_v49, %v1606_v50 }
 0x2c6   : > { %3050 = vmatmul.mubr.bf16.vlgmr.msra.gmra.mrb[4].mxu1 %v4887_v52  ;;  %3255 = vmatmul.mubr.bf16.vlgmr.msra.gmra.mrb[8].mxu0 %v4887_v52 }
 0x2c7   : > { %3059 = vmatpush1.bf16.msra.mxu1 %v3742_v56  ;;  %3090 = vmatprep.mubr.bf16.mxu1 %v4885_v51  ;;  %v1367_v56 = vld [vmem:[#allocation10 + $0x58] sm:$0xff] }
 0x2c8   : > { %3060 = vmatprep.subr.bf16.mxu1 %v3759_v57  ;;  %v3982_v57 = vcombine.low %v1598_v49, %v1606_v50  ;;  %v3745_v58 = vcombine.high %v1359_v55, %v1367_v56  ;;  %v1583_v50 = vld [vmem:[#allocation10 + $0x718] sm:$0xff] }
 0x2cb   : > { %3061 = vmatpush1.bf16.msra.mxu1 %v3758_v60  ;;  %v1383_v60 = vld [vmem:[#allocation10 + $0xd8] sm:$0xff] }
 0x2cc   : > { %3062 = vmatprep.subr.bf16.mxu1 %v3775_v61  ;;  %v3744_v61 = vcombine.low %v1359_v55, %v1367_v56  ;;  %v3761_v62 = vcombine.high %v1375_v59, %v1383_v60  ;;  %v1599_v56 = vld [vmem:[#allocation10 + $0x798] sm:$0xff] }
 0x2cf   : > { %3063 = vmatpush1.bf16.msra.mxu1 %v3774_v0  ;;  %v1399_v0 = vld [vmem:[#allocation10 + $0x158] sm:$0xff] }
 0x2d0   : > { %3064 = vmatprep.subr.bf16.mxu1 %v3791_v1  ;;  %v3760_v1 = vcombine.low %v1375_v59, %v1383_v60  ;;  %v3777_v2 = vcombine.high %v1391_v63, %v1399_v0  ;;  %v1361_v60 = vld [vmem:[#allocation10 + $0x28] sm:$0xff] }
 0x2d3   : > { %3065 = vmatpush1.bf16.msra.mxu1 %v3790_v4  ;;  %v1415_v4 = vld [vmem:[#allocation10 + $0x1d8] sm:$0xff] }
 0x2d4   : > { %3066 = vmatprep.subr.bf16.mxu1 %v3807_v5  ;;  %v3776_v5 = vcombine.low %v1391_v63, %v1399_v0  ;;  %v3793_v6 = vcombine.high %v1407_v3, %v1415_v4  ;;  %v1377_v0 = vld [vmem:[#allocation10 + $0xa8] sm:$0xff] }
 0x2d7   : > { %3067 = vmatpush1.bf16.msra.mxu1 %v3806_v8  ;;  %v1431_v8 = vld [vmem:[#allocation10 + $0x258] sm:$0xff] }
 0x2d8   : > { %3068 = vmatprep.subr.bf16.mxu1 %v3823_v9  ;;  %v3792_v9 = vcombine.low %v1407_v3, %v1415_v4  ;;  %v3809_v10 = vcombine.high %v1423_v7, %v1431_v8  ;;  %v1393_v4 = vld [vmem:[#allocation10 + $0x128] sm:$0xff] }
 0x2db   : > { %3069 = vmatpush1.bf16.msra.mxu1 %v3822_v12  ;;  %v1447_v12 = vld [vmem:[#allocation10 + $0x2d8] sm:$0xff] }
 0x2dc   : > { %3070 = vmatprep.subr.bf16.mxu1 %v3839_v13  ;;  %v3808_v13 = vcombine.low %v1423_v7, %v1431_v8  ;;  %v3825_v14 = vcombine.high %v1439_v11, %v1447_v12  ;;  %v1409_v8 = vld [vmem:[#allocation10 + $0x1a8] sm:$0xff] }
 0x2df   : > { %3071 = vmatpush1.bf16.msra.mxu1 %v3838_v16  ;;  %v1463_v16 = vld [vmem:[#allocation10 + $0x358] sm:$0xff] }
 0x2e0   : > { %3072 = vmatprep.subr.bf16.mxu1 %v3855_v17  ;;  %v3824_v17 = vcombine.low %v1439_v11, %v1447_v12  ;;  %v3841_v18 = vcombine.high %v1455_v15, %v1463_v16  ;;  %v1425_v12 = vld [vmem:[#allocation10 + $0x228] sm:$0xff] }
 0x2e3   : > { %3073 = vmatpush1.bf16.msra.mxu1 %v3854_v20  ;;  %v1479_v20 = vld [vmem:[#allocation10 + $0x3d8] sm:$0xff] }
 0x2e4   : > { %3074 = vmatprep.subr.bf16.mxu1 %v3871_v21  ;;  %v3840_v21 = vcombine.low %v1455_v15, %v1463_v16  ;;  %v3857_v22 = vcombine.high %v1471_v19, %v1479_v20  ;;  %v1441_v16 = vld [vmem:[#allocation10 + $0x2a8] sm:$0xff] }
 0x2e7   : > { %3075 = vmatpush1.bf16.msra.mxu1 %v3870_v24  ;;  %v1495_v24 = vld [vmem:[#allocation10 + $0x458] sm:$0xff] }
 0x2e8   : > { %3076 = vmatprep.subr.bf16.mxu1 %v3887_v25  ;;  %v3856_v25 = vcombine.low %v1471_v19, %v1479_v20  ;;  %v3873_v26 = vcombine.high %v1487_v23, %v1495_v24  ;;  %v4911_v19 = vld [vmem:[%s5155_s6] sm:$0xff]  ;;  %v4916_v20 = vld [vmem:[%s5155_s6 + $0x8] sm:$0xff] }
 0x2eb   : > { %3077 = vmatpush1.bf16.msra.mxu1 %v3886_v28  ;;  %v1511_v28 = vld [vmem:[#allocation10 + $0x4d8] sm:$0xff] }
 0x2ec   : > { %3078 = vmatprep.subr.bf16.mxu1 %v3903_v29  ;;  %v3872_v29 = vcombine.low %v1487_v23, %v1495_v24  ;;  %v3889_v30 = vcombine.high %v1503_v27, %v1511_v28  ;;  %v1465_v23 = vld [vmem:[#allocation10 + $0x368] sm:$0xff]  ;;  %v1619_v24 = vrot.slane %v4911_v19, %v4877_v34 }
 0x2ef   : > { %3079 = vmatpush1.bf16.msra.mxu1 %v3902_v32  ;;  %v1527_v32 = vld [vmem:[#allocation10 + $0x558] sm:$0xff] }
 0x2f0   : > { %3080 = vmatprep.subr.bf16.mxu1 %v3919_v35  ;;  %v3888_v35 = vcombine.low %v1503_v27, %v1511_v28  ;;  %v3905_v37 = vcombine.high %v1519_v31, %v1527_v32  ;;  %v1623_v28 = vrot.slane %v4911_v19, %v4881_v36 }
 0x2f3   : > { %3081 = vmatpush1.bf16.msra.mxu1 %v3918_v39  ;;  %v1543_v39 = vld [vmem:[#allocation10 + $0x5d8] sm:$0xff] }
 0x2f4   : > { %3082 = vmatprep.subr.bf16.mxu1 %v3935_v40  ;;  %v3904_v40 = vcombine.low %v1519_v31, %v1527_v32  ;;  %v3921_v41 = vcombine.high %v1535_v38, %v1543_v39  ;;  %v4936_v32 = vstv %s3323_s28 }
 0x2f7   : > { %3083 = vmatpush1.bf16.msra.mxu1 %v3934_v43  ;;  %v1559_v43 = vld [vmem:[#allocation10 + $0x658] sm:$0xff] }
 0x2f8   : > { %3084 = vmatprep.subr.bf16.mxu1 %v3951_v44  ;;  %v3920_v44 = vcombine.low %v1535_v38, %v1543_v39  ;;  %v3937_v45 = vcombine.high %v1551_v42, %v1559_v43  ;;  %v4335_v39 = vld [vmem:[#allocation12] sm:$0xff] }
 0x2fb   : > { %3085 = vmatpush1.bf16.msra.mxu1 %v3950_v47  ;;  %v1575_v47 = vld [vmem:[#allocation10 + $0x6d8] sm:$0xff] }
 0x2fc   : > { %3086 = vmatprep.subr.bf16.mxu1 %v3967_v48  ;;  %v3936_v48 = vcombine.low %v1551_v42, %v1559_v43  ;;  %v3953_v49 = vcombine.high %v1567_v46, %v1575_v47 }
 0x2ff   : > { %3087 = vmatpush1.bf16.msra.mxu1 %v3966_v53  ;;  %v1591_v53 = vld [vmem:[#allocation10 + $0x758] sm:$0xff] }
 0x300   : > { %3088 = vmatprep.subr.bf16.mxu1 %v3983_v54  ;;  %v3952_v54 = vcombine.low %v1567_v46, %v1575_v47  ;;  %v3969_v55 = vcombine.high %v1583_v50, %v1591_v53 }
 0x303   : > { %3089 = vmatpush1.bf16.msra.mxu1 %v3982_v57  ;;  %v1607_v57 = vld [vmem:[#allocation10 + $0x7d8] sm:$0xff] }
 0x304   : > { %3099 = vmatprep.subr.bf16.mxu1 %v3745_v58  ;;  %v3968_v58 = vcombine.low %v1583_v50, %v1591_v53  ;;  %v3985_v59 = vcombine.high %v1599_v56, %v1607_v57 }
 0x306   : > { %3091 = vmatmul.mubr.bf16.vlgmr.msra.gmra.mrb[8].mxu1 %v4887_v52 }
 0x307   : > { %3100 = vmatpush1.bf16.msra.mxu1 %v3744_v61  ;;  %3131 = vmatprep.mubr.bf16.mxu1 %v4885_v51  ;;  %v1369_v61 = vld [vmem:[#allocation10 + $0x68] sm:$0xff] }
 0x308   : > { %3101 = vmatprep.subr.bf16.mxu1 %v3761_v62  ;;  %v3984_v62 = vcombine.low %v1599_v56, %v1607_v57  ;;  %v3749_v63 = vcombine.high %v1361_v60, %v1369_v61  ;;  %v4947_v56 = vstv %s4920_s19 }
 0x30b   : > { %3102 = vmatpush1.bf16.msra.mxu1 %v3760_v1  ;;  %v1385_v1 = vld [vmem:[#allocation10 + $0xe8] sm:$0xff] }
 0x30c   : > { %3103 = vmatprep.subr.bf16.mxu1 %v3777_v2  ;;  %v3748_v2 = vcombine.low %v1361_v60, %v1369_v61  ;;  %v3765_v3 = vcombine.high %v1377_v0, %v1385_v1  ;;  %v4952_v61 = vstv %s4928_s24 }
 0x30f   : > { %3104 = vmatpush1.bf16.msra.mxu1 %v3776_v5  ;;  %v1401_v5 = vld [vmem:[#allocation10 + $0x168] sm:$0xff] }
 0x310   : > { %3105 = vmatprep.subr.bf16.mxu1 %v3793_v6  ;;  %v3764_v6 = vcombine.low %v1377_v0, %v1385_v1  ;;  %v3781_v7 = vcombine.high %v1393_v4, %v1401_v5 }
 0x313   : > { %3106 = vmatpush1.bf16.msra.mxu1 %v3792_v9  ;;  %v1417_v9 = vld [vmem:[#allocation10 + $0x1e8] sm:$0xff] }
 0x314   : > { %3107 = vmatprep.subr.bf16.mxu1 %v3809_v10  ;;  %v3780_v10 = vcombine.low %v1393_v4, %v1401_v5  ;;  %v3797_v11 = vcombine.high %v1409_v8, %v1417_v9  ;;  %v3399_v4 = vld [vmem:[%s4851_s11 + $0x8] sm:$0xff] }
 0x317   : > { %3108 = vmatpush1.bf16.msra.mxu1 %v3808_v13  ;;  %v1433_v13 = vld [vmem:[#allocation10 + $0x268] sm:$0xff] }
 0x318   : > { %3109 = vmatprep.subr.bf16.mxu1 %v3825_v14  ;;  %v3796_v14 = vcombine.low %v1409_v8, %v1417_v9  ;;  %v3813_v15 = vcombine.high %v1425_v12, %v1433_v13  ;;  %v1505_v8 = vld [vmem:[#allocation10 + $0x4a8] sm:$0xff] }
 0x319   : > { %v1513_v9 = vld [vmem:[#allocation10 + $0x4e8] sm:$0xff] }
 0x31b   : > { %3110 = vmatpush1.bf16.msra.mxu1 %v3824_v17  ;;  %v1449_v17 = vld [vmem:[#allocation10 + $0x2e8] sm:$0xff] }
 0x31c   : > { %3111 = vmatprep.subr.bf16.mxu1 %v3841_v18  ;;  %v3812_v18 = vcombine.low %v1425_v12, %v1433_v13  ;;  %v3828_v27 = vcombine.low %v1441_v16, %v1449_v17 }
 0x31f   : > { %3112 = vmatpush1.bf16.msra.mxu1 %v3840_v21  ;;  %v3829_v21 = vcombine.high %v1441_v16, %v1449_v17  ;;  %v3893_v16 = vcombine.high %v1505_v8, %v1513_v9 }
 0x320   : > { %3113 = vmatprep.subr.bf16.mxu1 %v3857_v22  ;;  %v1457_v22 = vld [vmem:[#allocation10 + $0x328] sm:$0xff] }
 0x323   : > { %3114 = vmatpush1.bf16.msra.mxu1 %v3856_v25  ;;  %v1651_v25 = vrot.slane %v4916_v20, %v4877_v34 }
 0x324   : > { %3115 = vmatprep.subr.bf16.mxu1 %v3873_v26  ;;  %v4930_v26 = vstv %s3321_s30 }
 0x327   : > { %3116 = vmatpush1.bf16.msra.mxu1 %v3872_v29  ;;  %v1655_v29 = vrot.slane %v4916_v20, %v4881_v36  ;;  %v4336_v36 = vld [vmem:[#allocation12 + $0x8] sm:$0xff] }
 0x328   : > { %3117 = vmatprep.subr.bf16.mxu1 %v3889_v30  ;;  %v3845_v30 = vcombine.high %v1457_v22, %v1465_v23 }
 0x32b   : > { %3118 = vmatpush1.bf16.msra.mxu1 %v3888_v35  ;;  %v1473_v35 = vld [vmem:[#allocation10 + $0x3a8] sm:$0xff] }
 0x32c   : > { %3119 = vmatprep.subr.bf16.mxu1 %v3905_v37  ;;  %v1481_v37 = vld [vmem:[#allocation10 + $0x3e8] sm:$0xff] }
 0x32d   : > { %v3860_v1 = vcombine.low %v1473_v35, %v1481_v37 }
 0x32f   : > { %3120 = vmatpush1.bf16.msra.mxu1 %v3904_v40  ;;  %v3331_v40 = vmul.f32 %v4335_v39, %v4930_v26 }
 0x330   : > { %3121 = vmatprep.subr.bf16.mxu1 %v3921_v41 }
 0x333   : > { %3122 = vmatpush1.bf16.msra.mxu1 %v3920_v44 }
 0x334   : > { %3123 = vmatprep.subr.bf16.mxu1 %v3937_v45  ;;  %v3332_v45 = vmul.f32 %v4336_v36, %v4930_v26 }
 0x337   : > { %3124 = vmatpush1.bf16.msra.mxu1 %v3936_v48 }
 0x338   : > { %3125 = vmatprep.subr.bf16.mxu1 %v3953_v49  ;;  %v3844_v49 = vcombine.low %v1457_v22, %v1465_v23 }
 0x33b   : > { %3126 = vmatpush1.bf16.msra.mxu1 %v3952_v54 }
 0x33c   : > { %3127 = vmatprep.subr.bf16.mxu1 %v3969_v55  ;;  %v3861_v55 = vcombine.high %v1473_v35, %v1481_v37 }
 0x33f   : > { %3128 = vmatpush1.bf16.msra.mxu1 %v3968_v58  ;;  %v1489_v58 = vld [vmem:[#allocation10 + $0x428] sm:$0xff] }
 0x340   : > { %3129 = vmatprep.subr.bf16.mxu1 %v3985_v59  ;;  %v1497_v59 = vld [vmem:[#allocation10 + $0x468] sm:$0xff] }
 0x341   : > { %v3877_v5 = vcombine.high %v1489_v58, %v1497_v59 }
 0x343   : > { %3130 = vmatpush1.bf16.msra.mxu1 %v3984_v62  ;;  %v3398_v62 = vld [vmem:[%s4851_s11] sm:$0xff] }
 0x344   : > { %3181 = vmatprep.subr.bf16.mxu1 %v3749_v63  ;;  %v4956_v63 = vstv %s4926_s26 }
 0x345   : > { %v3408_v13 = vmul.f32 %v4956_v63, %v3399_v4  ;;  %v1395_v4 = vld [vmem:[#allocation10 + $0x138] sm:$0xff] }
 0x346   : > { %3132 = vmatmul.mubr.bf16.vlgmr.msra.gmra.mrb[12].mxu1 %v4887_v52 }
 0x347   : > { %3182 = vmatpush1.bf16.msra.mxu1 %v3748_v2  ;;  %3213 = vmatprep.mubr.bf16.mxu1 %v4885_v51 }
 0x348   : > { %3183 = vmatprep.subr.bf16.mxu1 %v3765_v3  ;;  %v3382_v3 = vmul.f32 %v4335_v39, %v4947_v56  ;;  %v1553_v39 = vld [vmem:[#allocation10 + $0x628] sm:$0xff] }
 0x34b   : > { %3184 = vmatpush1.bf16.msra.mxu1 %v3764_v6  ;;  %v3383_v6 = vmul.f32 %v4336_v36, %v4947_v56  ;;  %v1577_v36 = vld [vmem:[#allocation10 + $0x6e8] sm:$0xff] }
 0x34c   : > { %3185 = vmatprep.subr.bf16.mxu1 %v3781_v7 }
 0x34f   : > { %3186 = vmatpush1.bf16.msra.mxu1 %v3780_v10 }
 0x350   : > { %3187 = vmatprep.subr.bf16.mxu1 %v3797_v11  ;;  %v3407_v11 = vmul.f32 %v4956_v63, %v3398_v62 }
 0x353   : > { %3188 = vmatpush1.bf16.msra.mxu1 %v3796_v14  ;;  %v3876_v14 = vcombine.low %v1489_v58, %v1497_v59  ;;  %v1363_v58 = vld [vmem:[#allocation10 + $0x38] sm:$0xff] }
 0x354   : > { %3189 = vmatprep.subr.bf16.mxu1 %v3813_v15  ;;  %v1371_v59 = vld [vmem:[#allocation10 + $0x78] sm:$0xff] }
 0x355   : > { %v3753_v62 = vcombine.high %v1363_v58, %v1371_v59 }
 0x357   : > { %3190 = vmatpush1.bf16.msra.mxu1 %v3812_v18  ;;  %v1521_v18 = vld [vmem:[#allocation10 + $0x528] sm:$0xff] }
 0x358   : > { %3191 = vmatprep.subr.bf16.mxu1 %v3829_v21  ;;  %v1529_v21 = vld [vmem:[#allocation10 + $0x568] sm:$0xff] }
 0x359   : > { %v3010_v31 = vpop.f32.mrb[0].mxu1  ;;  %v3174_v34 = vpop.f32.mrb[4].mxu0  ;;  %v3908_v35 = vcombine.low %v1521_v18, %v1529_v21 }
 0x35a   : > { %v4938_v38 = vadd.f32 %v3010_v31, %v1619_v24  ;;  %v3175_v41 = vadd.f32 %v3174_v34, %v1651_v25  ;;  %v3012_v42 = vpop.f32.mrb[1].mxu1  ;;  %v3176_v43 = vpop.f32.mrb[5].mxu0  ;;  %v1537_v31 = vld [vmem:[#allocation10 + $0x5a8] sm:$0xff] }
 0x35b   : > { %v4941_v44 = vadd.f32 %v3012_v42, %v1623_v28  ;;  %v3177_v46 = vadd.f32 %v3176_v43, %v1655_v29  ;;  %3192 = vmatpush1.bf16.msra.mxu1 %v3828_v27  ;;  %v3014_v47 = vpop.f32.mrb[2].mxu1  ;;  %v3178_v48 = vpop.f32.mrb[6].mxu0  ;;  %v3892_v28 = vcombine.low %v1505_v8, %v1513_v9  ;;  %v1545_v34 = vld [vmem:[#allocation10 + $0x5e8] sm:$0xff]  ;;  %v1411_v8 = vld [vmem:[#allocation10 + $0x1b8] sm:$0xff] }
 0x35c   : > { %v3340_v50 = vmul.f32 %v4936_v32, %v4938_v38  ;;  %4319 = vtanh.f32 %v3175_v41  ;;  %v3015_v53 = vpop.f32.mrb[3].mxu1  ;;  %v3179_v54 = vpop.f32.mrb[7].mxu0  ;;  %3193 = vmatprep.subr.bf16.mxu1 %v3845_v30  ;;  %v3909_v30 = vcombine.high %v1521_v18, %v1529_v21  ;;  %v3925_v37 = vcombine.high %v1537_v31, %v1545_v34  ;;  %v1569_v43 = vld [vmem:[#allocation10 + $0x6a8] sm:$0xff]  ;;  %v1419_v9 = vld [vmem:[#allocation10 + $0x1f8] sm:$0xff]  ;;  %3435 = vst [vmem:[#allocation13] sm:$0xff] (!%p4003_p5), %v4938_v38 }
 0x35d   : > { %v3341_v57 = vmul.f32 %v4936_v32, %v4941_v44  ;;  %4321 = vtanh.f32 %v3177_v46  ;;  %v3924_v41 = vcombine.low %v1537_v31, %v1545_v34  ;;  %v3957_v46 = vcombine.high %v1569_v43, %v1577_v36  ;;  %v1585_v47 = vld [vmem:[#allocation10 + $0x728] sm:$0xff]  ;;  %3436 = vst [vmem:[#allocation13 + $0x8] sm:$0xff] (!%p4003_p5), %v4941_v44 }
 0x35e   : > { %v3348_v60 = vsub.f32 %v3331_v40, %v3340_v50  ;;  %v1561_v40 = vld [vmem:[#allocation10 + $0x668] sm:$0xff]  ;;  %v1626_v18 = vsub.s32 2, %v4874_v33 }
 0x35f   : > { %v3349_v0 = vsub.f32 %v3332_v45, %v3341_v57  ;;  %3194 = vmatpush1.bf16.msra.mxu1 %v3844_v49  ;;  %v3941_v42 = vcombine.high %v1553_v39, %v1561_v40  ;;  %v3940_v45 = vcombine.low %v1553_v39, %v1561_v40  ;;  %v1593_v48 = vld [vmem:[#allocation10 + $0x768] sm:$0xff]  ;;  %v3956_v49 = vcombine.low %v1569_v43, %v1577_v36  ;;  %v1483_v43 = vld [vmem:[#allocation10 + $0x3f8] sm:$0xff] }
 0x360   : > { %v3995_v2 = vclamps-f32 %v3348_v60, 1.0  ;;  %3195 = vmatprep.subr.bf16.mxu1 %v3861_v55  ;;  %v3973_v50 = vcombine.high %v1585_v47, %v1593_v48  ;;  %v1601_v53 = vld [vmem:[#allocation10 + $0x7a8] sm:$0xff]  ;;  %v3972_v55 = vcombine.low %v1585_v47, %v1593_v48 }
 0x361   : > { %v3996_v7 = vclamps-f32 %v3349_v0, 1.0  ;;  %v1609_v54 = vld [vmem:[#allocation10 + $0x7e8] sm:$0xff]  ;;  %v1379_v0 = vld [vmem:[#allocation10 + $0xb8] sm:$0xff] }
 0x362   : > { %v3373_v10 = vmul.f32 %v3995_v2, %v4952_v61  ;;  %v3989_v57 = vcombine.high %v1601_v53, %v1609_v54  ;;  %v3988_v60 = vcombine.low %v1601_v53, %v1609_v54  ;;  %v3752_v2 = vcombine.low %v1363_v58, %v1371_v59  ;;  %v4338_v53 = vld [vmem:[#allocation12 + $0x18] sm:$0xff] }
 0x363   : > { %v3374_v12 = vmul.f32 %v3996_v7, %v4952_v61  ;;  %3196 = vmatpush1.bf16.msra.mxu1 %v3860_v1  ;;  %v1387_v1 = vld [vmem:[#allocation10 + $0xf8] sm:$0xff]  ;;  %v3334_v54 = vmul.f32 %v4338_v53, %v4930_v26 }
 0x364   : > { %v3390_v15 = vadd.f32 %v3382_v3, %v3373_v10  ;;  %3197 = vmatprep.subr.bf16.mxu1 %v3877_v5  ;;  %v3769_v3 = vcombine.high %v1379_v0, %v1387_v1  ;;  %v1403_v5 = vld [vmem:[#allocation10 + $0x178] sm:$0xff] }
 0x365   : > { %v3391_v17 = vadd.f32 %v3383_v6, %v3374_v12  ;;  %v3768_v6 = vcombine.low %v1379_v0, %v1387_v1  ;;  %v3785_v7 = vcombine.high %v1395_v4, %v1403_v5  ;;  %v3784_v10 = vcombine.low %v1395_v4, %v1403_v5  ;;  %v1427_v12 = vld [vmem:[#allocation10 + $0x238] sm:$0xff] }
 0x366   : > { %v4320_v22 = vpop.eup %4319  ;;  %v3415_v23 = vadd.f32 %v3407_v11, %v3390_v15  ;;  %v3801_v11 = vcombine.high %v1411_v8, %v1419_v9  ;;  %v1499_v4 = vld [vmem:[#allocation10 + $0x478] sm:$0xff] }
 0x367   : > { %v4322_v24 = vpop.eup %4321  ;;  %v4965_v25 = vmul.f32 2.0, %v4320_v22  ;;  %v3416_v27 = vadd.f32 %v3408_v13, %v3391_v17  ;;  %3198 = vmatpush1.bf16.msra.mxu1 %v3876_v14  ;;  %v1435_v13 = vld [vmem:[#allocation10 + $0x278] sm:$0xff]  ;;  %v3800_v14 = vcombine.low %v1411_v8, %v1419_v9  ;;  %v1630_v22 = vsub.s32 3, %v4874_v33 }
 0x368   : > { %3423 = vst [vmem:[#allocation12] sm:$0xff] %v3415_v23  ;;  %v4967_v29 = vmul.f32 2.0, %v4322_v24  ;;  %3199 = vmatprep.subr.bf16.mxu1 %v3893_v16  ;;  %v3817_v15 = vcombine.high %v1427_v12, %v1435_v13  ;;  %v1443_v16 = vld [vmem:[#allocation10 + $0x2b8] sm:$0xff]  ;;  %v3816_v21 = vcombine.low %v1427_v12, %v1435_v13  ;;  %v1638_v23 = vsub.s32 5, %v4874_v33 }
 0x369   : > { %3424 = vst [vmem:[#allocation12 + $0x8] sm:$0xff] %v3416_v27  ;;  %v1451_v17 = vld [vmem:[#allocation10 + $0x2f8] sm:$0xff]  ;;  %v1631_v34 = vrot.slane %v4911_v19, %v1630_v22  ;;  %3443 = vst [vmem:[#allocation15] sm:$0xff] (!%p4003_p5), %v4965_v25 }
 0x36a   : > { %v3833_v24 = vcombine.high %v1443_v16, %v1451_v17  ;;  %v1459_v27 = vld [vmem:[#allocation10 + $0x338] sm:$0xff]  ;;  %3444 = vst [vmem:[#allocation15 + $0x8] sm:$0xff] (!%p4003_p5), %v4967_v29 }
 0x36b   : > { %3200 = vmatpush1.bf16.msra.mxu1 %v3892_v28  ;;  %v1467_v28 = vld [vmem:[#allocation10 + $0x378] sm:$0xff] }
 0x36c   : > { %3201 = vmatprep.subr.bf16.mxu1 %v3909_v30  ;;  %v1627_v30 = vrot.slane %v4911_v19, %v1626_v18  ;;  %v3849_v39 = vcombine.high %v1459_v27, %v1467_v28  ;;  %v3848_v59 = vcombine.low %v1459_v27, %v1467_v28 }
 0x36f   : > { %3202 = vmatpush1.bf16.msra.mxu1 %v3908_v35  ;;  %v1671_v35 = vrot.slane %v4916_v20, %v1638_v23 }
 0x370   : > { %3203 = vmatprep.subr.bf16.mxu1 %v3925_v37  ;;  %v3832_v37 = vcombine.low %v1443_v16, %v1451_v17  ;;  %v1515_v16 = vld [vmem:[#allocation10 + $0x4f8] sm:$0xff] }
 0x373   : > { %3204 = vmatpush1.bf16.msra.mxu1 %v3924_v41 }
 0x374   : > { %3205 = vmatprep.subr.bf16.mxu1 %v3941_v42  ;;  %v1475_v42 = vld [vmem:[#allocation10 + $0x3b8] sm:$0xff] }
 0x375   : > { %v3865_v1 = vcombine.high %v1475_v42, %v1483_v43  ;;  %v3864_v8 = vcombine.low %v1475_v42, %v1483_v43 }
 0x377   : > { %3206 = vmatpush1.bf16.msra.mxu1 %v3940_v45  ;;  %v4337_v45 = vld [vmem:[#allocation12 + $0x10] sm:$0xff] }
 0x378   : > { %3207 = vmatprep.subr.bf16.mxu1 %v3957_v46  ;;  %v3333_v46 = vmul.f32 %v4337_v45, %v4930_v26 }
 0x37b   : > { %3208 = vmatpush1.bf16.msra.mxu1 %v3956_v49 }
 0x37c   : > { %3209 = vmatprep.subr.bf16.mxu1 %v3973_v50 }
 0x37f   : > { %3210 = vmatpush1.bf16.msra.mxu1 %v3972_v55 }
 0x380   : > { %3211 = vmatprep.subr.bf16.mxu1 %v3989_v57 }
 0x383   : > { %3212 = vmatpush1.bf16.msra.mxu1 %v3988_v60 }
 0x384   : > { %3263 = vmatprep.subr.bf16.mxu1 %v3753_v62 }
 0x386   : > { %3214 = vmatmul.mubr.bf16.vlgmr.msra.gmra.mrb[16].mxu1 %v4887_v52 }
 0x387   : > { %3264 = vmatpush1.bf16.msra.mxu1 %v3752_v2  ;;  %3295 = vmatprep.mubr.bf16.mxu1 %v4885_v51  ;;  %v1634_v51 = vsub.s32 4, %v4874_v33 }
 0x388   : > { %3265 = vmatprep.subr.bf16.mxu1 %v3769_v3  ;;  %v1491_v3 = vld [vmem:[#allocation10 + $0x438] sm:$0xff] }
 0x389   : > { %v1667_v31 = vrot.slane %v4916_v20, %v1634_v51  ;;  %v3881_v12 = vcombine.high %v1491_v3, %v1499_v4  ;;  %v3880_v28 = vcombine.low %v1491_v3, %v1499_v4  ;;  %v1595_v3 = vld [vmem:[#allocation10 + $0x778] sm:$0xff] }
 0x38b   : > { %3266 = vmatpush1.bf16.msra.mxu1 %v3768_v6  ;;  %v3400_v6 = vld [vmem:[%s4851_s11 + $0x10] sm:$0xff] }
 0x38c   : > { %3267 = vmatprep.subr.bf16.mxu1 %v3785_v7 }
 0x38f   : > { %3268 = vmatpush1.bf16.msra.mxu1 %v3784_v10  ;;  %v3384_v10 = vmul.f32 %v4337_v45, %v4947_v56 }
 0x390   : > { %3269 = vmatprep.subr.bf16.mxu1 %v3801_v11  ;;  %v3401_v11 = vld [vmem:[%s4851_s11 + $0x18] sm:$0xff] }
 0x391   : > { %v3410_v27 = vmul.f32 %v4956_v63, %v3401_v11  ;;  %v1635_v11 = vrot.slane %v4911_v19, %v1634_v51 }
 0x393   : > { %3270 = vmatpush1.bf16.msra.mxu1 %v3800_v14  ;;  %v3385_v14 = vmul.f32 %v4338_v53, %v4947_v56 }
 0x394   : > { %3271 = vmatprep.subr.bf16.mxu1 %v3817_v15  ;;  %v1507_v15 = vld [vmem:[#allocation10 + $0x4b8] sm:$0xff] }
 0x395   : > { %v3896_v45 = vcombine.low %v1507_v15, %v1515_v16 }
 0x397   : > { %3272 = vmatpush1.bf16.msra.mxu1 %v3816_v21  ;;  %v3409_v21 = vmul.f32 %v4956_v63, %v3400_v6  ;;  %v1603_v6 = vld [vmem:[#allocation10 + $0x7b8] sm:$0xff] }
 0x398   : > { %3273 = vmatprep.subr.bf16.mxu1 %v3833_v24 }
 0x399   : > { %v3051_v40 = vpop.f32.mrb[4].mxu1  ;;  %v3256_v41 = vpop.f32.mrb[8].mxu0 }
 0x39a   : > { %v4987_v36 = vadd.f32 %v3051_v40, %v1627_v30  ;;  %v3257_v47 = vadd.f32 %v3256_v41, %v1667_v31  ;;  %v3053_v48 = vpop.f32.mrb[5].mxu1  ;;  %v3258_v49 = vpop.f32.mrb[9].mxu0  ;;  %v3897_v31 = vcombine.high %v1507_v15, %v1515_v16  ;;  %v4339_v15 = vld [vmem:[#allocation12 + $0x20] sm:$0xff] }
 0x39b   : > { %v4990_v50 = vadd.f32 %v3053_v48, %v1631_v34  ;;  %v3259_v55 = vadd.f32 %v3258_v49, %v1671_v35  ;;  %v3055_v57 = vpop.f32.mrb[6].mxu1  ;;  %v3260_v58 = vpop.f32.mrb[10].mxu0  ;;  %3274 = vmatpush1.bf16.msra.mxu1 %v3832_v37  ;;  %v1523_v35 = vld [vmem:[#allocation10 + $0x538] sm:$0xff]  ;;  %v3335_v16 = vmul.f32 %v4339_v15, %v4930_v26 }
 0x39c   : > { %v3342_v60 = vmul.f32 %v4936_v32, %v4987_v36  ;;  %4323 = vtanh.f32 %v3257_v47  ;;  %v3056_v62 = vpop.f32.mrb[7].mxu1  ;;  %v3261_v0 = vpop.f32.mrb[11].mxu0  ;;  %3275 = vmatprep.subr.bf16.mxu1 %v3849_v39  ;;  %v1531_v37 = vld [vmem:[#allocation10 + $0x578] sm:$0xff]  ;;  %3437 = vst [vmem:[#allocation13 + $0x10] sm:$0xff] (!%p4003_p5), %v4987_v36 }
 0x39d   : > { %v3343_v2 = vmul.f32 %v4936_v32, %v4990_v50  ;;  %4325 = vtanh.f32 %v3259_v55  ;;  %v3913_v47 = vcombine.high %v1523_v35, %v1531_v37  ;;  %v1539_v48 = vld [vmem:[#allocation10 + $0x5b8] sm:$0xff]  ;;  %v3912_v53 = vcombine.low %v1523_v35, %v1531_v37  ;;  %3438 = vst [vmem:[#allocation13 + $0x18] sm:$0xff] (!%p4003_p5), %v4990_v50 }
 0x39e   : > { %v3350_v5 = vsub.f32 %v3333_v46, %v3342_v60  ;;  %v1547_v49 = vld [vmem:[#allocation10 + $0x5f8] sm:$0xff]  ;;  %v3386_v37 = vmul.f32 %v4339_v15, %v4947_v56 }
 0x39f   : > { %v3351_v7 = vsub.f32 %v3334_v54, %v3343_v2  ;;  %3276 = vmatpush1.bf16.msra.mxu1 %v3848_v59  ;;  %v3929_v54 = vcombine.high %v1539_v48, %v1547_v49  ;;  %v1555_v55 = vld [vmem:[#allocation10 + $0x638] sm:$0xff]  ;;  %v3928_v58 = vcombine.low %v1539_v48, %v1547_v49 }
 0x3a0   : > { %v3997_v9 = vclamps-f32 %v3350_v5, 1.0  ;;  %3277 = vmatprep.subr.bf16.mxu1 %v3865_v1  ;;  %v1563_v57 = vld [vmem:[#allocation10 + $0x678] sm:$0xff] }
 0x3a1   : > { %v3998_v13 = vclamps-f32 %v3351_v7, 1.0  ;;  %v3945_v59 = vcombine.high %v1555_v55, %v1563_v57  ;;  %v1571_v60 = vld [vmem:[#allocation10 + $0x6b8] sm:$0xff]  ;;  %v3944_v0 = vcombine.low %v1555_v55, %v1563_v57  ;;  %v1642_v57 = vsub.s32 6, %v4874_v33 }
 0x3a2   : > { %v3375_v17 = vmul.f32 %v3997_v9, %v4952_v61  ;;  %v1579_v62 = vld [vmem:[#allocation10 + $0x6f8] sm:$0xff] }
 0x3a3   : > { %v3376_v24 = vmul.f32 %v3998_v13, %v4952_v61  ;;  %3278 = vmatpush1.bf16.msra.mxu1 %v3864_v8  ;;  %v3961_v1 = vcombine.high %v1571_v60, %v1579_v62  ;;  %v1587_v2 = vld [vmem:[#allocation10 + $0x738] sm:$0xff]  ;;  %v3960_v4 = vcombine.low %v1571_v60, %v1579_v62 }
 0x3a4   : > { %v3392_v30 = vadd.f32 %v3384_v10, %v3375_v17  ;;  %3279 = vmatprep.subr.bf16.mxu1 %v3881_v12  ;;  %v3977_v5 = vcombine.high %v1587_v2, %v1595_v3  ;;  %v1611_v7 = vld [vmem:[#allocation10 + $0x7f8] sm:$0xff]  ;;  %v3976_v8 = vcombine.low %v1587_v2, %v1595_v3  ;;  %v1639_v12 = vrot.slane %v4911_v19, %v1638_v23 }
 0x3a5   : > { %v3393_v34 = vadd.f32 %v3385_v14, %v3376_v24  ;;  %v3993_v9 = vcombine.high %v1603_v6, %v1611_v7  ;;  %v3992_v10 = vcombine.low %v1603_v6, %v1611_v7 }
 0x3a6   : > { %v4324_v39 = vpop.eup %4323  ;;  %v3417_v40 = vadd.f32 %v3409_v21, %v3392_v30 }
 0x3a7   : > { %v4326_v41 = vpop.eup %4325  ;;  %v5005_v42 = vmul.f32 2.0, %v4324_v39  ;;  %v3418_v43 = vadd.f32 %v3410_v27, %v3393_v34  ;;  %3280 = vmatpush1.bf16.msra.mxu1 %v3880_v28  ;;  %v3403_v39 = vld [vmem:[%s4851_s11 + $0x28] sm:$0xff] }
 0x3a8   : > { %3425 = vst [vmem:[#allocation12 + $0x10] sm:$0xff] %v3417_v40  ;;  %v5007_v46 = vmul.f32 2.0, %v4326_v41  ;;  %3281 = vmatprep.subr.bf16.mxu1 %v3897_v31  ;;  %v3402_v31 = vld [vmem:[%s4851_s11 + $0x20] sm:$0xff]  ;;  %v3412_v48 = vmul.f32 %v4956_v63, %v3403_v39 }
 0x3a9   : > { %3426 = vst [vmem:[#allocation12 + $0x18] sm:$0xff] %v3418_v43  ;;  %3447 = vst [vmem:[#allocation15 + $0x20] sm:$0xff] (!%p4003_p5), %v5005_v42 }
 0x3aa   : > { %3448 = vst [vmem:[#allocation15 + $0x28] sm:$0xff] (!%p4003_p5), %v5007_v46 }
 0x3ab   : > { %3282 = vmatpush1.bf16.msra.mxu1 %v3896_v45  ;;  %v3411_v45 = vmul.f32 %v4956_v63, %v3402_v31  ;;  %v1659_v31 = vrot.slane %v4916_v20, %v1626_v18 }
 0x3ac   : > { %3283 = vmatprep.subr.bf16.mxu1 %v3913_v47 }
 0x3af   : > { %3284 = vmatpush1.bf16.msra.mxu1 %v3912_v53 }
 0x3b0   : > { %3285 = vmatprep.subr.bf16.mxu1 %v3929_v54 }
 0x3b3   : > { %3286 = vmatpush1.bf16.msra.mxu1 %v3928_v58  ;;  %v1646_v58 = vsub.s32 7, %v4874_v33 }
 0x3b4   : > { %3287 = vmatprep.subr.bf16.mxu1 %v3945_v59  ;;  %v1643_v59 = vrot.slane %v4911_v19, %v1642_v57 }
 0x3b5   : > { %v1647_v60 = vrot.slane %v4911_v19, %v1646_v58  ;;  %v1679_v18 = vrot.slane %v4916_v20, %v1646_v58 }
 0x3b7   : > { %3288 = vmatpush1.bf16.msra.mxu1 %v3944_v0 }
 0x3b8   : > { %3289 = vmatprep.subr.bf16.mxu1 %v3961_v1  ;;  %v4341_v1 = vld [vmem:[#allocation12 + $0x30] sm:$0xff] }
 0x3b9   : > { %v3337_v2 = vmul.f32 %v4341_v1, %v4930_v26  ;;  %v3388_v15 = vmul.f32 %v4341_v1, %v4947_v56 }
 0x3bb   : > { %3290 = vmatpush1.bf16.msra.mxu1 %v3960_v4 }
 0x3bc   : > { %3291 = vmatprep.subr.bf16.mxu1 %v3977_v5  ;;  %v4342_v5 = vld [vmem:[#allocation12 + $0x38] sm:$0xff] }
 0x3bd   : > { %v3338_v6 = vmul.f32 %v4342_v5, %v4930_v26 }
 0x3bf   : > { %3292 = vmatpush1.bf16.msra.mxu1 %v3976_v8 }
 0x3c0   : > { %3293 = vmatprep.subr.bf16.mxu1 %v3993_v9 }
 0x3c3   : > { %3294 = vmatpush1.bf16.msra.mxu1 %v3992_v10 }
 0x3c6   : > { %3296 = vmatmul.mubr.bf16.vlgmr.msra.gmra.mrb[20].mxu1 %v4887_v52  ;;  %v4340_v52 = vld [vmem:[#allocation12 + $0x28] sm:$0xff] }
 0x3c7   : > { %v3336_v24 = vmul.f32 %v4340_v52, %v4930_v26  ;;  %v3387_v41 = vmul.f32 %v4340_v52, %v4947_v56  ;;  %v3389_v52 = vmul.f32 %v4342_v5, %v4947_v56  ;;  %v1663_v56 = vrot.slane %v4916_v20, %v1630_v22 }
 0x3d9   : > { %v3092_v13 = vpop.f32.mrb[8].mxu1 }
 0x3da   : > { %v5016_v14 = vadd.f32 %v3092_v13, %v1635_v11  ;;  %v3094_v17 = vpop.f32.mrb[9].mxu1  ;;  %v3404_v11 = vld [vmem:[%s4851_s11 + $0x30] sm:$0xff] }
 0x3db   : > { %v5019_v21 = vadd.f32 %v3094_v17, %v1639_v12  ;;  %v3096_v27 = vpop.f32.mrb[10].mxu1  ;;  %v3413_v26 = vmul.f32 %v4956_v63, %v3404_v11 }
 0x3dc   : > { %v3344_v51 = vmul.f32 %v4936_v32, %v5016_v14  ;;  %v3097_v28 = vpop.f32.mrb[11].mxu1  ;;  %3439 = vst [vmem:[#allocation13 + $0x20] sm:$0xff] (!%p4003_p5), %v5016_v14 }
 0x3dd   : > { %v3345_v23 = vmul.f32 %v4936_v32, %v5019_v21  ;;  %3440 = vst [vmem:[#allocation13 + $0x28] sm:$0xff] (!%p4003_p5), %v5019_v21 }
 0x3de   : > { %v3352_v30 = vsub.f32 %v3335_v16, %v3344_v51  ;;  %v3405_v16 = vld [vmem:[%s4851_s11 + $0x38] sm:$0xff] }
 0x3df   : > { %v3353_v34 = vsub.f32 %v3336_v24, %v3345_v23  ;;  %v3414_v51 = vmul.f32 %v4956_v63, %v3405_v16 }
 0x3e0   : > { %v3999_v35 = vclamps-f32 %v3352_v30, 1.0 }
 0x3e1   : > { %v4000_v40 = vclamps-f32 %v3353_v34, 1.0 }
 0x3e2   : > { %v3377_v43 = vmul.f32 %v3999_v35, %v4952_v61 }
 0x3e3   : > { %v3378_v47 = vmul.f32 %v4000_v40, %v4952_v61 }
 0x3e4   : > { %v3394_v49 = vadd.f32 %v3386_v37, %v3377_v43 }
 0x3e5   : > { %v3395_v53 = vadd.f32 %v3387_v41, %v3378_v47  ;;  %v1675_v47 = vrot.slane %v4916_v20, %v1642_v57 }
 0x3e6   : > { %v3419_v54 = vadd.f32 %v3411_v45, %v3394_v49 }
 0x3e7   : > { %v3420_v55 = vadd.f32 %v3412_v48, %v3395_v53 }
 0x3e8   : > { %3427 = vst [vmem:[#allocation12 + $0x20] sm:$0xff] %v3419_v54 }
 0x3e9   : > { %3428 = vst [vmem:[#allocation12 + $0x28] sm:$0xff] %v3420_v55 }
 0x419   : > { %v3133_v62 = vpop.f32.mrb[12].mxu1 }
 0x41a   : > { %v5038_v0 = vadd.f32 %v3133_v62, %v1643_v59  ;;  %v3135_v3 = vpop.f32.mrb[13].mxu1 }
 0x41b   : > { %v3136_v4 = vadd.f32 %v3135_v3, %v1647_v60  ;;  %v3137_v7 = vpop.f32.mrb[14].mxu1 }
 0x41c   : > { %v3346_v8 = vmul.f32 %v4936_v32, %v5038_v0  ;;  %v3138_v9 = vpop.f32.mrb[15].mxu1  ;;  %3441 = vst [vmem:[#allocation13 + $0x30] sm:$0xff] (!%p4003_p5), %v5038_v0 }
 0x41d   : > { %v3347_v10 = vmul.f32 %v4936_v32, %v3136_v4  ;;  %3442 = vst [vmem:[#allocation13 + $0x38] sm:$0xff] (!%p4003_p5), %v3136_v4 }
 0x41e   : > { %v3354_v19 = vsub.f32 %v3337_v2, %v3346_v8 }
 0x41f   : > { %v3355_v12 = vsub.f32 %v3338_v6, %v3347_v10 }
 0x420   : > { %v4001_v13 = vclamps-f32 %v3354_v19, 1.0 }
 0x421   : > { %v4002_v17 = vclamps-f32 %v3355_v12, 1.0 }
 0x422   : > { %v3379_v24 = vmul.f32 %v4001_v13, %v4952_v61 }
 0x423   : > { %v3380_v27 = vmul.f32 %v4002_v17, %v4952_v61 }
 0x424   : > { %v3396_v28 = vadd.f32 %v3388_v15, %v3379_v24 }
 0x425   : > { %v3397_v32 = vadd.f32 %v3389_v52, %v3380_v27 }
 0x426   : > { %v3421_v23 = vadd.f32 %v3413_v26, %v3396_v28 }
 0x427   : > { %v3422_v30 = vadd.f32 %v3414_v51, %v3397_v32 }
 0x428   : > { %3429 = vst [vmem:[#allocation12 + $0x30] sm:$0xff] %v3421_v23 }
 0x429   : > { %3430 = vst [vmem:[#allocation12 + $0x38] sm:$0xff] %v3422_v30 }
 0x459   : > { %v3215_v34 = vpop.f32.mrb[16].mxu1 }
 0x45a   : > { %v3216_v35 = vadd.f32 %v3215_v34, %v1659_v31  ;;  %v3217_v37 = vpop.f32.mrb[17].mxu1 }
 0x45b   : > { %v3218_v61 = vadd.f32 %v3217_v37, %v1663_v56  ;;  %v3219_v39 = vpop.f32.mrb[18].mxu1 }
 0x45c   : > { %4327 = vtanh.f32 %v3216_v35  ;;  %v3220_v63 = vpop.f32.mrb[19].mxu1 }
 0x45d   : > { %4329 = vtanh.f32 %v3218_v61 }
 0x466   : > { %v4328_v40 = vpop.eup %4327 }
 0x467   : > { %v4330_v41 = vpop.eup %4329  ;;  %v3314_v43 = vmul.f32 2.0, %v4328_v40 }
 0x468   : > { %v3315_v45 = vmul.f32 2.0, %v4330_v41 }
 0x469   : > { %3445 = vst [vmem:[#allocation15 + $0x10] sm:$0xff] (!%p4003_p5), %v3314_v43 }
 0x46a   : > { %3446 = vst [vmem:[#allocation15 + $0x18] sm:$0xff] (!%p4003_p5), %v3315_v45 }
 0x499   : > { %v3297_v48 = vpop.f32.mrb[20].mxu1 }
 0x49a   : > { %v3298_v33 = vadd.f32 %v3297_v48, %v1675_v47  ;;  %v3299_v49 = vpop.f32.mrb[21].mxu1 }
 0x49b   : > { %v3300_v22 = vadd.f32 %v3299_v49, %v1679_v18  ;;  %v3301_v53 = vpop.f32.mrb[22].mxu1 }
 0x49c   : > { %4331 = vtanh.f32 %v3298_v33  ;;  %v3302_v54 = vpop.f32.mrb[23].mxu1 }
 0x49d   : > { %4333 = vtanh.f32 %v3300_v22 }
 0x4a2   : > { %3434 = sbr.rel (%p4003_p5) target bundleno = 1195 (0x4ab), region = 68 }
 0x4a6   : > { %v4332_v55 = vpop.eup %4331 }
 0x4a7   : > { %v4334_v59 = vpop.eup %4333  ;;  %v3318_v60 = vmul.f32 2.0, %v4332_v55 }
 0x4a8   : > { %v3319_v62 = vmul.f32 2.0, %v4334_v59 }
 0x4a9   : > { %3449 = vst [vmem:[#allocation15 + $0x30] sm:$0xff] %v3318_v60 }
 0x4aa   : > { %3450 = vst [vmem:[#allocation15 + $0x38] sm:$0xff] %v3319_v62 }
 0x4ab PF: > { %p4074_p8 = scmp.eq.s32.totalorder %s4689_s17, 9  ;;  %s4614_s11 = smov [#allocation13]  }
 0x4ac   : > { %s3469_s18 = sshll.u32 %s4614_s11, 4  ;;  %s4615_s16 = smov [#allocation12]   ;;  %s3470_s18 = int_to_ptr.vmem [resolvable:$true] %s3469_s18 }
 0x4ad   : > { %s3458_s25 = sshll.u32 %s4615_s16, 4  ;;  %s4469_s29 = scalar_lea.vmem %s3470_s18, 1024  ;;  %s3459_s25 = int_to_ptr.vmem [resolvable:$true] %s3458_s25 }
 0x4ae   : > { %p4470_p0 = scmp.ne.s32.totalorder %s3470_s18, %s4469_s29  ;;  %p4476_p7 = scmp.lt.s32.totalorder %s3470_s18, %s3470_s18 }
 0x4af   : > { %p4477_p6 = scmp.lt.s32.totalorder %s4469_s29, %s4469_s29 }
 0x4b0   : > { %p4471_p2 = pnand %p4470_p0, %p4074_p8 }
 0x4b1   : > { %p4478_p9 = por %p4477_p6, %p4476_p7 }
 0x4b2   : > { %p4472_p12 = pneg %p4471_p2 }
 0x4b4   : > { %p4479_p13 = pnand %p4478_p9, %p4472_p12 }
 0x4b6   : > { %4482 = shalt.err (!%p4479_p13)
}
 0x4b7   : > { %s4483_s22 = scalar_lea.hbm %s5157_s8, 1024 }
 0x4b8   : > { %p4484_p10 = scmp.ne.s32.totalorder %s5157_s8, %s4483_s22  ;;  %p4489_p3 = scmp.lt.u32.totalorder %s4483_s22, %s5157_s8 }
 0x4ba   : > { %p4485_p11 = pnand %p4484_p10, %p4074_p8 }
 0x4bc   : > { %p4486_p1 = pneg %p4485_p11 }
 0x4be   : > { %p4491_p4 = pnand %p4489_p3, %p4486_p1 }
 0x4c0   : > { %4494 = shalt.err (!%p4491_p4)
}
 0x4c1   : > { %4044 = dma.vmem_to_hbm [thread:$0]  (%p4074_p8), %s3470_s18, 1024, %s5157_s8, [#allocation14]  }
 0x4c2   : > { %s4495_s19 = scalar_lea.vmem %s3459_s25, 1024  ;;  %p4502_p12 = scmp.lt.s32.totalorder %s3459_s25, %s3459_s25 }
 0x4c3   : > { %p4496_p5 = scmp.ne.s32.totalorder %s3459_s25, %s4495_s19  ;;  %p4503_p7 = scmp.lt.s32.totalorder %s4495_s19, %s4495_s19 }
 0x4c5   : > { %p4497_p0 = pnand %p4496_p5, %p4074_p8  ;;  %p4504_p6 = por %p4503_p7, %p4502_p12 }
 0x4c7   : > { %p4498_p2 = pneg %p4497_p0 }
 0x4c9   : > { %p4505_p9 = pnand %p4504_p6, %p4498_p2 }
 0x4cb   : > { %4508 = shalt.err (!%p4505_p9)
}
 0x4cc   : > { %s4509_s11 = scalar_lea.hbm %s5156_s7, 1024 }
 0x4cd   : > { %p4510_p13 = scmp.ne.s32.totalorder %s5156_s7, %s4509_s11  ;;  %p4515_p1 = scmp.lt.u32.totalorder %s4509_s11, %s5156_s7 }
 0x4cf   : > { %p4511_p10 = pnand %p4510_p13, %p4074_p8 }
 0x4d1   : > { %p4512_p11 = pneg %p4511_p10 }
 0x4d3   : > { %p4517_p3 = pnand %p4515_p1, %p4512_p11 }
 0x4d5   : > { %4520 = shalt.err (!%p4517_p3)
}
 0x4d6   : > { %4042 = dma.vmem_to_hbm [thread:$0]  (%p4074_p8), %s3459_s25, 1024, %s5156_s7, [#allocation6]  }
 0x4d7   : > { %s4616_s10 = smov [#allocation15]  }
 0x4d8   : > { %s3480_s12 = sshll.u32 %s4616_s10, 4  ;;  %s3481_s12 = int_to_ptr.vmem [resolvable:$true] %s3480_s12 }
 0x4d9   : > { %s4521_s13 = scalar_lea.vmem %s3481_s12, 1024  ;;  %p4528_p2 = scmp.lt.s32.totalorder %s3481_s12, %s3481_s12 }
 0x4da   : > { %p4522_p4 = scmp.ne.s32.totalorder %s3481_s12, %s4521_s13  ;;  %p4529_p12 = scmp.lt.s32.totalorder %s4521_s13, %s4521_s13 }
 0x4dc   : > { %p4523_p5 = pnand %p4522_p4, %p4074_p8  ;;  %p4530_p7 = por %p4529_p12, %p4528_p2 }
 0x4de   : > { %p4524_p0 = pneg %p4523_p5 }
 0x4e0   : > { %p4531_p6 = pnand %p4530_p7, %p4524_p0 }
 0x4e2   : > { %4534 = shalt.err (!%p4531_p6)
}
 0x4e3   : > { %s4535_s23 = scalar_lea.hbm %s5158_s9, 1024 }
 0x4e4   : > { %p4536_p9 = scmp.ne.s32.totalorder %s5158_s9, %s4535_s23  ;;  %p4541_p11 = scmp.lt.u32.totalorder %s4535_s23, %s5158_s9 }
 0x4e6   : > { %p4537_p13 = pnand %p4536_p9, %p4074_p8 }
 0x4e8   : > { %p4538_p10 = pneg %p4537_p13 }
 0x4ea   : > { %p4543_p1 = pnand %p4541_p11, %p4538_p10 }
 0x4ec   : > { %4546 = shalt.err (!%p4543_p1)
}
 0x4ed   : > { %4046 = dma.vmem_to_hbm [thread:$0]  (%p4074_p8), %s3481_s12, 1024, %s5158_s9, [#allocation14]  }
 0x4ee   : > { %4582 = dma.done.wait (%p4074_p8), [#allocation6], 1024  }
 0x4ef   : > { %4584 = vsyncadd (%p4074_p8), [#allocation6], 4294966272 }
 0x4f0   : > { %4586 = dma.done.wait (%p4074_p8), [#allocation14], 2048  }
 0x4f1   : > { %4588 = vsyncadd (%p4074_p8), [#allocation14], 4294965248 }
 0x4f2 PF: > { %p30_p3 = scmp.ge.s32.totalorder %s4792_s20, 12   ;;  %s5176_s0 = smov %s4595_s14 }
 0x4f3   : > { %s5177_s14 = smov %s4599_s15  ;;  %s5178_s15 = smov %s4802_s27 }
 0x4f4   : > { %s5179_s16 = smov %s4792_s20  ;;  %32 = sbr.rel (!%p30_p3) target bundleno = 22 (0x16), region = 121 }
 0x4fb   :  { %3501 = vsyncpa [#allocation5], 1 }
 0x4fc   :  { %3503 = vsyncpa [#allocation5 + $0x1], 1 }
 0x4fd   :  { %3504 = vsyncpa [#allocation8], 1 }
 0x4fe   :  { %3506 = vsyncpa [#allocation8 + $0x1], 1 }
 0x4ff   :  { %3507 = vsyncpa [#allocation11], 1 }
 0x500   :  { %3508 = vsyncpa [#allocation6], 1 }
 0x501   :  { %3510 = vsyncpa [#allocation6 + $0x1], 1 }
 0x502   :  { %3511 = vsyncpa [#allocation14], 1 }

</bundles_post_ra>
